<compile_context>
chip_gen: v7x
topology: tpu7x:2x2x1
jax: 0.10.0
libtpu: 0.0.40
codegen_flags: <defaults>
</compile_context>

<pallas_src>
import math

import jax
import jax.numpy as jnp
import numpy as np
from jax.experimental import pallas as pl
from jax.experimental.pallas import tpu as pltpu

_K = 3  # all convs in the module are 3x3, stride 1, no padding


# ---------------------------------------------------------------------------
# Host-side constants (numpy -> XLA constants under jit)
# ---------------------------------------------------------------------------
def _build_constants(n):
    """Selection / mask matrices for a batch of n 16x16 images."""
    hw = 16 * 16            # encoder grid positions per example
    enc_w, valid_w = 16, 12  # encoder output is 12x12 on the 16x16 working grid

    # 64QAM gather: flatten(NCHW) columns 0,2,..,30 (real) and 33,35,..,63 (imag)
    # all live in channel 0; map them to (1, 2*16n) via one matmul.
    sg = np.zeros((n * hw, 2 * 16 * n), np.float32)
    for b in range(n):
        for s in range(16):
            jr, ji = 2 * s, 2 * s + 33
            pr = (jr // valid_w) * enc_w + (jr % valid_w)
            pi = (ji // valid_w) * enc_w + (ji % valid_w)
            sg[b * hw + pr, b * 16 + s] = 1.0
            sg[b * hw + pi, 16 * n + b * 16 + s] = 1.0

    # channel one-hot for the (n,16) -> (n,4,2,2) reshape of the symbols
    cm = np.zeros((4, 16 * n), np.float32)
    for b in range(n):
        for s in range(16):
            cm[s // 4, b * 16 + s] = 1.0

    # scatter the 2x2 symbol image (zero-padded by 2, i.e. ConvTranspose padding)
    # onto an 8x8-per-example decoder grid: symbols land at rows/cols 4..5.
    lga = n * 64 + 128
    ps = np.zeros((16 * n, lga), np.float32)
    for b in range(n):
        for s in range(16):
            u, v = (s % 4) // 2, s % 2
            ps[b * 16 + s, b * 64 + (4 + u) * 8 + (4 + v)] = 1.0

    # dec1 interior mask = zero padding of the second transposed conv
    m1 = np.zeros((1, n * 64 + 64), np.float32)
    for b in range(n):
        for gy in range(2, 6):
            for gx in range(2, 6):
                m1[0, b * 64 + gy * 8 + gx] = 1.0
    return sg, cm, ps, m1


# ---------------------------------------------------------------------------
# Fused forward kernel
# ---------------------------------------------------------------------------
def _fused_forward(x2d, packed, consts, n):
    L = n * 256          # encoder grid lanes (valid region)
    L1 = L + 64          # conv1 working width (lets conv2 read shifted windows)
    LD = n * 64          # decoder grid lanes (= kernel output width)
    LD1 = LD + 64        # dec1 working width
    LGA = LD + 128       # decoder stage-A (zero-padded symbol grid) width

    def kernel(x_ref, w1_ref, b1_ref, w2_ref, b2_ref,
               sg_ref, cm_ref, ps_ref, m1_ref,
               wd1_ref, bd1_ref, wd2_ref, bd2_ref,
               out_ref,
               patch_ref, a1_ref, ga_ref, d1_ref):

        # one-time zeroing: unused (channel-padded) im2col rows multiply zero
        # weights, so they must never hold non-finite garbage.
        patch_ref[...] = jnp.zeros_like(patch_ref)

        def conv_relu(src_ref, w_ref, b_ref, cin, wgrid, width):
            """Valid 3x3 conv + bias + ReLU in lane-dense (C, lanes) layout.

            im2col: 9 shifted-window copies into a shared VMEM scratch whose rows
            are tap-major / channel-minor, channels padded to 8 (sublane aligned),
            then ONE MXU matmul with f32 accumulation.
            """
            for dy in range(_K):
                for dx in range(_K):
                    t = dy * _K + dx
                    off = dy * wgrid + dx
                    patch_ref[t * 8:t * 8 + cin, 0:width] = src_ref[:, off:off + width]
            acc = jnp.dot(w_ref[...], patch_ref[:, 0:width],
                          preferred_element_type=jnp.float32)
            return jnp.maximum(acc + b_ref[...], 0.0)

        # ------------------------ encoder ------------------------
        a1_ref[...] = conv_relu(x_ref, w1_ref, b1_ref, 3, 16, L1)   # (8, L1)
        enc = conv_relu(a1_ref, w2_ref, b2_ref, 8, 16, L)           # (4, L)

        # ------------------------ 64QAM modulation ------------------------
        # flatten() only touches the first 64 features == encoder channel 0;
        # gather real/imag columns with one selection matmul.
        gathered = jnp.dot(enc[0:1, :], sg_ref[...],
                           preferred_element_type=jnp.float32)      # (1, 2*16n)
        half = gathered.shape[1] // 2
        re = jnp.round(gathered[:, 0:half] * 2.0) * 0.5
        im = jnp.round(gathered[:, half:] * 2.0) * 0.5
        # reference uses argmax of |c - t| (farthest constellation point); keep it.
        best = (re + 3.0) ** 2 + im * im
        idx = jnp.zeros_like(best)
        for i, t in enumerate((-1.0, 1.0, 3.0), start=1):
            d = (re - t) ** 2 + im * im
            take = d > best                      # strict '>': first max wins
            idx = jnp.where(take, float(i), idx)
            best = jnp.where(take, d, best)
        mod = 2.0 * idx - 3.0                                        # (1, 16n)

        # scatter the (n,4,2,2) symbol image onto the zero-padded decoder grid
        ga_ref[...] = jnp.dot(cm_ref[...] * mod, ps_ref[...],
                              preferred_element_type=jnp.float32)    # (4, LGA)

        # ---------------- decoder (ConvTranspose == valid conv on padded grid) ----
        d1_ref[...] = conv_relu(ga_ref, wd1_ref, bd1_ref, 4, 8, LD1) * m1_ref[...]
        out_ref[...] = conv_relu(d1_ref, wd2_ref, bd2_ref, 8, 8, LD)  # (3, LD)

    sg, cm, ps, m1 = consts
    flops = 2 * 72 * (8 * L1 + 4 * L + 8 * LD1 + 3 * LD) \
        + 2 * sg.shape[0] * sg.shape[1] + 2 * 4 * ps.shape[0] * LGA
    nbytes = 4 * (x2d.size + sg.size + cm.size + ps.size + m1.size + 3 * LD
                  + sum(int(v.size) for v in packed.values()))
    vmem_spec = pl.BlockSpec(memory_space=pltpu.MemorySpace.VMEM)

    return pl.pallas_call(
        kernel,
        out_shape=jax.ShapeDtypeStruct((3, LD), jnp.float32),
        in_specs=[vmem_spec] * 13,
        out_specs=vmem_spec,
        scratch_shapes=[
            pltpu.VMEM((_K * _K * 8, L1), jnp.float32),   # shared im2col buffer
            pltpu.VMEM((8, L1), jnp.float32),             # conv1 output grid
            pltpu.VMEM((4, LGA), jnp.float32),            # decoder stage-A grid
            pltpu.VMEM((8, LD1), jnp.float32),            # dec1 output grid
        ],
        cost_estimate=pl.CostEstimate(flops=flops, transcendentals=0,
                                      bytes_accessed=nbytes),
    )(x2d,
      packed["w1"], packed["b1"], packed["w2"], packed["b2"],
      jnp.asarray(sg), jnp.asarray(cm), jnp.asarray(ps), jnp.asarray(m1),
      packed["wd1"], packed["bd1"], packed["wd2"], packed["bd2"])


# ---------------------------------------------------------------------------
# Parameters
# ---------------------------------------------------------------------------
def init_params(key):
    """PyTorch-style layers/layout: Conv2d (Cout,Cin,K,K), ConvTranspose2d (Cin,Cout,K,K)."""
    ks = jax.random.split(key, 8)

    def u(k, shape, fan_in):
        b = 1.0 / math.sqrt(fan_in)
        return jax.random.uniform(k, shape, jnp.float32, -b, b)

    K = _K
    return {
        "enc1_w": u(ks[0], (8, 3, K, K), 3 * K * K), "enc1_b": u(ks[1], (8,), 3 * K * K),
        "enc2_w": u(ks[2], (4, 8, K, K), 8 * K * K), "enc2_b": u(ks[3], (4,), 8 * K * K),
        "dec1_w": u(ks[4], (4, 8, K, K), 8 * K * K), "dec1_b": u(ks[5], (8,), 8 * K * K),
        "dec2_w": u(ks[6], (8, 3, K, K), 3 * K * K), "dec2_b": u(ks[7], (3,), 3 * K * K),
    }


def pack_params(params):
    """Pack weights into kernel-ready matrices (done ONCE, outside the forward)."""
    def conv_mat(w):
        # (Cout, Cin, K, K) -> (Cout, K*K*8): rows tap-major / channel-minor,
        # channels zero-padded to 8 so every im2col row block is sublane aligned.
        co, ci, k, _ = w.shape
        m = jnp.transpose(w, (2, 3, 1, 0)).reshape(k * k, ci, co)
        m = jnp.pad(m, ((0, 0), (0, 8 - ci), (0, 0)))
        return m.reshape(k * k * 8, co).T

    def deconv_mat(wt):
        # ConvTranspose2d weight (Cin, Cout, K, K): flip spatially, swap in/out.
        return conv_mat(jnp.transpose(wt[:, :, ::-1, ::-1], (1, 0, 2, 3)))

    return {
        "w1": conv_mat(params["enc1_w"]),   "b1": params["enc1_b"][:, None],
        "w2": conv_mat(params["enc2_w"]),   "b2": params["enc2_b"][:, None],
        "wd1": deconv_mat(params["dec1_w"]), "bd1": params["dec1_b"][:, None],
        "wd2": deconv_mat(params["dec2_w"]), "bd2": params["dec2_b"][:, None],
    }


# ---------------------------------------------------------------------------
# Forward pass
# ---------------------------------------------------------------------------
@jax.jit
def autoencoder_forward(packed, x):
    n, c, h, w = x.shape
    if (c, h, w) != (3, 16, 16):
        raise ValueError("this demo kernel is specialized to (N, 3, 16, 16) inputs")
    # TODO(synk): the original module's `.view(-1, 4, 252, 252)` only type-checks
    # for 256x256 inputs with batch % 15876 == 0; as before we keep the identical
    # pipeline but reshape the 16 symbols per example to (-1, 4, 2, 2).

    # lane-dense channel-major layout; lane padding so every shifted im2col
    # window read inside the kernel stays in bounds.
    x2d = jnp.transpose(x, (1, 0, 2, 3)).reshape(3, n * h * w)
    x2d = jnp.pad(x2d, ((0, 0), (0, 128)))

    out2d = _fused_forward(x2d, packed, _build_constants(n), n)   # (3, n*64)
    out = out2d.reshape(3, n, 8, 8)[:, :, :6, :6]                 # valid 6x6 region
    return jnp.transpose(out, (1, 0, 2, 3))                       # (n, 3, 6, 6)


if __name__ == "__main__":
    key = jax.random.PRNGKey(0)
    pkey, xkey = jax.random.split(key)

    params = init_params(pkey)
    packed = pack_params(params)
    x = jax.random.normal(xkey, (2, 3, 16, 16), dtype=jnp.float32)  # NCHW

    out = autoencoder_forward(packed, x)
    out = jax.block_until_ready(out)

    assert out.shape == (2, 3, 6, 6), out.shape
    assert out.dtype == jnp.float32
    assert bool(jnp.all(jnp.isfinite(out)))
    print("KERNEL_OK")
</pallas_src>

<mosaic_0001>
module attributes {stable_mosaic.version = 11 : i64} {
  func.func @kernel(%arg0: memref<3x640xf32, #tpu.memory_space<vmem>>, %arg1: memref<8x72xf32, #tpu.memory_space<vmem>>, %arg2: memref<8x1xf32, #tpu.memory_space<vmem>>, %arg3: memref<4x72xf32, #tpu.memory_space<vmem>>, %arg4: memref<4x1xf32, #tpu.memory_space<vmem>>, %arg5: memref<512x64xf32, #tpu.memory_space<vmem>>, %arg6: memref<4x32xf32, #tpu.memory_space<vmem>>, %arg7: memref<32x256xf32, #tpu.memory_space<vmem>>, %arg8: memref<1x192xf32, #tpu.memory_space<vmem>>, %arg9: memref<8x72xf32, #tpu.memory_space<vmem>>, %arg10: memref<8x1xf32, #tpu.memory_space<vmem>>, %arg11: memref<3x72xf32, #tpu.memory_space<vmem>>, %arg12: memref<3x1xf32, #tpu.memory_space<vmem>>, %arg13: memref<3x128xf32, #tpu.memory_space<vmem>>, %arg14: memref<72x576xf32, #tpu.memory_space<vmem>>, %arg15: memref<8x576xf32, #tpu.memory_space<vmem>>, %arg16: memref<4x256xf32, #tpu.memory_space<vmem>>, %arg17: memref<8x192xf32, #tpu.memory_space<vmem>>) attributes {dimension_semantics = [], scalar_prefetch = 0 : i64, scratch_operands = 4 : i64, tpu.core_type = #tpu.core_type<tc>} {
    %cst = arith.constant 0.000000e+00 : f32
    %0 = vector.broadcast %cst : f32 to vector<72x576xf32>
    %c0 = arith.constant 0 : index
    %c0_0 = arith.constant 0 : index
    %1 = vector.load %arg14[%c0, %c0_0] : memref<72x576xf32, #tpu.memory_space<vmem>>, vector<72x576xf32>
    tpu.vector_store %arg14[%c0, %c0_0], %0 {strides = array<i32>} : memref<72x576xf32, #tpu.memory_space<vmem>>, vector<72x576xf32>,
    %c0_1 = arith.constant 0 : index
    %c0_2 = arith.constant 0 : index
    %2 = vector.load %arg0[%c0_1, %c0_2] : memref<3x640xf32, #tpu.memory_space<vmem>>, vector<3x576xf32>
    %c0_3 = arith.constant 0 : index
    %c0_4 = arith.constant 0 : index
    %3 = vector.load %arg14[%c0_3, %c0_4] : memref<72x576xf32, #tpu.memory_space<vmem>>, vector<3x576xf32>
    tpu.vector_store %arg14[%c0_3, %c0_4], %2 {strides = array<i32>} : memref<72x576xf32, #tpu.memory_space<vmem>>, vector<3x576xf32>,
    %c0_5 = arith.constant 0 : index
    %c1 = arith.constant 1 : index
    %4 = vector.load %arg0[%c0_5, %c1] : memref<3x640xf32, #tpu.memory_space<vmem>>, vector<3x576xf32>
    %c8 = arith.constant 8 : index
    %c0_6 = arith.constant 0 : index
    %5 = vector.load %arg14[%c8, %c0_6] : memref<72x576xf32, #tpu.memory_space<vmem>>, vector<3x576xf32>
    tpu.vector_store %arg14[%c8, %c0_6], %4 {strides = array<i32>} : memref<72x576xf32, #tpu.memory_space<vmem>>, vector<3x576xf32>,
    %c0_7 = arith.constant 0 : index
    %c2 = arith.constant 2 : index
    %6 = vector.load %arg0[%c0_7, %c2] : memref<3x640xf32, #tpu.memory_space<vmem>>, vector<3x576xf32>
    %c16 = arith.constant 16 : index
    %c0_8 = arith.constant 0 : index
    %7 = vector.load %arg14[%c16, %c0_8] : memref<72x576xf32, #tpu.memory_space<vmem>>, vector<3x576xf32>
    tpu.vector_store %arg14[%c16, %c0_8], %6 {strides = array<i32>} : memref<72x576xf32, #tpu.memory_space<vmem>>, vector<3x576xf32>,
    %c0_9 = arith.constant 0 : index
    %c16_10 = arith.constant 16 : index
    %8 = vector.load %arg0[%c0_9, %c16_10] : memref<3x640xf32, #tpu.memory_space<vmem>>, vector<3x576xf32>
    %c24 = arith.constant 24 : index
    %c0_11 = arith.constant 0 : index
    %9 = vector.load %arg14[%c24, %c0_11] : memref<72x576xf32, #tpu.memory_space<vmem>>, vector<3x576xf32>
    tpu.vector_store %arg14[%c24, %c0_11], %8 {strides = array<i32>} : memref<72x576xf32, #tpu.memory_space<vmem>>, vector<3x576xf32>,
    %c0_12 = arith.constant 0 : index
    %c17 = arith.constant 17 : index
    %10 = vector.load %arg0[%c0_12, %c17] : memref<3x640xf32, #tpu.memory_space<vmem>>, vector<3x576xf32>
    %c32 = arith.constant 32 : index
    %c0_13 = arith.constant 0 : index
    %11 = vector.load %arg14[%c32, %c0_13] : memref<72x576xf32, #tpu.memory_space<vmem>>, vector<3x576xf32>
    tpu.vector_store %arg14[%c32, %c0_13], %10 {strides = array<i32>} : memref<72x576xf32, #tpu.memory_space<vmem>>, vector<3x576xf32>,
    %c0_14 = arith.constant 0 : index
    %c18 = arith.constant 18 : index
    %12 = vector.load %arg0[%c0_14, %c18] : memref<3x640xf32, #tpu.memory_space<vmem>>, vector<3x576xf32>
    %c40 = arith.constant 40 : index
    %c0_15 = arith.constant 0 : index
    %13 = vector.load %arg14[%c40, %c0_15] : memref<72x576xf32, #tpu.memory_space<vmem>>, vector<3x576xf32>
    tpu.vector_store %arg14[%c40, %c0_15], %12 {strides = array<i32>} : memref<72x576xf32, #tpu.memory_space<vmem>>, vector<3x576xf32>,
    %c0_16 = arith.constant 0 : index
    %c32_17 = arith.constant 32 : index
    %14 = vector.load %arg0[%c0_16, %c32_17] : memref<3x640xf32, #tpu.memory_space<vmem>>, vector<3x576xf32>
    %c48 = arith.constant 48 : index
    %c0_18 = arith.constant 0 : index
    %15 = vector.load %arg14[%c48, %c0_18] : memref<72x576xf32, #tpu.memory_space<vmem>>, vector<3x576xf32>
    tpu.vector_store %arg14[%c48, %c0_18], %14 {strides = array<i32>} : memref<72x576xf32, #tpu.memory_space<vmem>>, vector<3x576xf32>,
    %c0_19 = arith.constant 0 : index
    %c33 = arith.constant 33 : index
    %16 = vector.load %arg0[%c0_19, %c33] : memref<3x640xf32, #tpu.memory_space<vmem>>, vector<3x576xf32>
    %c56 = arith.constant 56 : index
    %c0_20 = arith.constant 0 : index
    %17 = vector.load %arg14[%c56, %c0_20] : memref<72x576xf32, #tpu.memory_space<vmem>>, vector<3x576xf32>
    tpu.vector_store %arg14[%c56, %c0_20], %16 {strides = array<i32>} : memref<72x576xf32, #tpu.memory_space<vmem>>, vector<3x576xf32>,
    %c0_21 = arith.constant 0 : index
    %c34 = arith.constant 34 : index
    %18 = vector.load %arg0[%c0_21, %c34] : memref<3x640xf32, #tpu.memory_space<vmem>>, vector<3x576xf32>
    %c64 = arith.constant 64 : index
    %c0_22 = arith.constant 0 : index
    %19 = vector.load %arg14[%c64, %c0_22] : memref<72x576xf32, #tpu.memory_space<vmem>>, vector<3x576xf32>
    tpu.vector_store %arg14[%c64, %c0_22], %18 {strides = array<i32>} : memref<72x576xf32, #tpu.memory_space<vmem>>, vector<3x576xf32>,
    %c0_23 = arith.constant 0 : index
    %c0_24 = arith.constant 0 : index
    %20 = vector.load %arg1[%c0_23, %c0_24] : memref<8x72xf32, #tpu.memory_space<vmem>>, vector<8x72xf32>
    %c0_25 = arith.constant 0 : index
    %c0_26 = arith.constant 0 : index
    %21 = vector.load %arg14[%c0_25, %c0_26] : memref<72x576xf32, #tpu.memory_space<vmem>>, vector<72x576xf32>
    %cst_27 = arith.constant dense<0.000000e+00> : vector<8x576xf32>
    %22 = tpu.matmul %20, %21, %cst_27 {dimension_numbers = #tpu.dot_dimension_numbers<[1], [0], [0], [1], [0, 0, 1, 1], [], []>} : vector<8x72xf32>, vector<72x576xf32>, vector<8x576xf32> -> vector<8x576xf32>
    %c0_28 = arith.constant 0 : index
    %c0_29 = arith.constant 0 : index
    %23 = vector.load %arg2[%c0_28, %c0_29] : memref<8x1xf32, #tpu.memory_space<vmem>>, vector<8x1xf32>
    %24 = vector.broadcast %23 : vector<8x1xf32> to vector<8x576xf32>
    %25 = arith.addf %22, %24 : vector<8x576xf32>
    %cst_30 = arith.constant 0.000000e+00 : f32
    %26 = vector.broadcast %cst_30 : f32 to vector<8x576xf32>
    %27 = arith.maximumf %25, %26 : vector<8x576xf32>
    %c0_31 = arith.constant 0 : index
    %c0_32 = arith.constant 0 : index
    %28 = vector.load %arg15[%c0_31, %c0_32] : memref<8x576xf32, #tpu.memory_space<vmem>>, vector<8x576xf32>
    tpu.vector_store %arg15[%c0_31, %c0_32], %27 {strides = array<i32>} : memref<8x576xf32, #tpu.memory_space<vmem>>, vector<8x576xf32>,
    %c0_33 = arith.constant 0 : index
    %c0_34 = arith.constant 0 : index
    %29 = vector.load %arg15[%c0_33, %c0_34] : memref<8x576xf32, #tpu.memory_space<vmem>>, vector<8x512xf32>
    %c0_35 = arith.constant 0 : index
    %c0_36 = arith.constant 0 : index
    %30 = vector.load %arg14[%c0_35, %c0_36] : memref<72x576xf32, #tpu.memory_space<vmem>>, vector<8x512xf32>
    tpu.vector_store %arg14[%c0_35, %c0_36], %29 {strides = array<i32>} : memref<72x576xf32, #tpu.memory_space<vmem>>, vector<8x512xf32>,
    %c0_37 = arith.constant 0 : index
    %c1_38 = arith.constant 1 : index
    %31 = vector.load %arg15[%c0_37, %c1_38] : memref<8x576xf32, #tpu.memory_space<vmem>>, vector<8x512xf32>
    %c8_39 = arith.constant 8 : index
    %c0_40 = arith.constant 0 : index
    %32 = vector.load %arg14[%c8_39, %c0_40] : memref<72x576xf32, #tpu.memory_space<vmem>>, vector<8x512xf32>
    tpu.vector_store %arg14[%c8_39, %c0_40], %31 {strides = array<i32>} : memref<72x576xf32, #tpu.memory_space<vmem>>, vector<8x512xf32>,
    %c0_41 = arith.constant 0 : index
    %c2_42 = arith.constant 2 : index
    %33 = vector.load %arg15[%c0_41, %c2_42] : memref<8x576xf32, #tpu.memory_space<vmem>>, vector<8x512xf32>
    %c16_43 = arith.constant 16 : index
    %c0_44 = arith.constant 0 : index
    %34 = vector.load %arg14[%c16_43, %c0_44] : memref<72x576xf32, #tpu.memory_space<vmem>>, vector<8x512xf32>
    tpu.vector_store %arg14[%c16_43, %c0_44], %33 {strides = array<i32>} : memref<72x576xf32, #tpu.memory_space<vmem>>, vector<8x512xf32>,
    %c0_45 = arith.constant 0 : index
    %c16_46 = arith.constant 16 : index
    %35 = vector.load %arg15[%c0_45, %c16_46] : memref<8x576xf32, #tpu.memory_space<vmem>>, vector<8x512xf32>
    %c24_47 = arith.constant 24 : index
    %c0_48 = arith.constant 0 : index
    %36 = vector.load %arg14[%c24_47, %c0_48] : memref<72x576xf32, #tpu.memory_space<vmem>>, vector<8x512xf32>
    tpu.vector_store %arg14[%c24_47, %c0_48], %35 {strides = array<i32>} : memref<72x576xf32, #tpu.memory_space<vmem>>, vector<8x512xf32>,
    %c0_49 = arith.constant 0 : index
    %c17_50 = arith.constant 17 : index
    %37 = vector.load %arg15[%c0_49, %c17_50] : memref<8x576xf32, #tpu.memory_space<vmem>>, vector<8x512xf32>
    %c32_51 = arith.constant 32 : index
    %c0_52 = arith.constant 0 : index
    %38 = vector.load %arg14[%c32_51, %c0_52] : memref<72x576xf32, #tpu.memory_space<vmem>>, vector<8x512xf32>
    tpu.vector_store %arg14[%c32_51, %c0_52], %37 {strides = array<i32>} : memref<72x576xf32, #tpu.memory_space<vmem>>, vector<8x512xf32>,
    %c0_53 = arith.constant 0 : index
    %c18_54 = arith.constant 18 : index
    %39 = vector.load %arg15[%c0_53, %c18_54] : memref<8x576xf32, #tpu.memory_space<vmem>>, vector<8x512xf32>
    %c40_55 = arith.constant 40 : index
    %c0_56 = arith.constant 0 : index
    %40 = vector.load %arg14[%c40_55, %c0_56] : memref<72x576xf32, #tpu.memory_space<vmem>>, vector<8x512xf32>
    tpu.vector_store %arg14[%c40_55, %c0_56], %39 {strides = array<i32>} : memref<72x576xf32, #tpu.memory_space<vmem>>, vector<8x512xf32>,
    %c0_57 = arith.constant 0 : index
    %c32_58 = arith.constant 32 : index
    %41 = vector.load %arg15[%c0_57, %c32_58] : memref<8x576xf32, #tpu.memory_space<vmem>>, vector<8x512xf32>
    %c48_59 = arith.constant 48 : index
    %c0_60 = arith.constant 0 : index
    %42 = vector.load %arg14[%c48_59, %c0_60] : memref<72x576xf32, #tpu.memory_space<vmem>>, vector<8x512xf32>
    tpu.vector_store %arg14[%c48_59, %c0_60], %41 {strides = array<i32>} : memref<72x576xf32, #tpu.memory_space<vmem>>, vector<8x512xf32>,
    %c0_61 = arith.constant 0 : index
    %c33_62 = arith.constant 33 : index
    %43 = vector.load %arg15[%c0_61, %c33_62] : memref<8x576xf32, #tpu.memory_space<vmem>>, vector<8x512xf32>
    %c56_63 = arith.constant 56 : index
    %c0_64 = arith.constant 0 : index
    %44 = vector.load %arg14[%c56_63, %c0_64] : memref<72x576xf32, #tpu.memory_space<vmem>>, vector<8x512xf32>
    tpu.vector_store %arg14[%c56_63, %c0_64], %43 {strides = array<i32>} : memref<72x576xf32, #tpu.memory_space<vmem>>, vector<8x512xf32>,
    %c0_65 = arith.constant 0 : index
    %c34_66 = arith.constant 34 : index
    %45 = vector.load %arg15[%c0_65, %c34_66] : memref<8x576xf32, #tpu.memory_space<vmem>>, vector<8x512xf32>
    %c64_67 = arith.constant 64 : index
    %c0_68 = arith.constant 0 : index
    %46 = vector.load %arg14[%c64_67, %c0_68] : memref<72x576xf32, #tpu.memory_space<vmem>>, vector<8x512xf32>
    tpu.vector_store %arg14[%c64_67, %c0_68], %45 {strides = array<i32>} : memref<72x576xf32, #tpu.memory_space<vmem>>, vector<8x512xf32>,
    %c0_69 = arith.constant 0 : index
    %c0_70 = arith.constant 0 : index
    %47 = vector.load %arg3[%c0_69, %c0_70] : memref<4x72xf32, #tpu.memory_space<vmem>>, vector<4x72xf32>
    %c0_71 = arith.constant 0 : index
    %c0_72 = arith.constant 0 : index
    %48 = vector.load %arg14[%c0_71, %c0_72] : memref<72x576xf32, #tpu.memory_space<vmem>>, vector<72x512xf32>
    %cst_73 = arith.constant dense<0.000000e+00> : vector<4x512xf32>
    %49 = tpu.matmul %47, %48, %cst_73 {dimension_numbers = #tpu.dot_dimension_numbers<[1], [0], [0], [1], [0, 0, 1, 1], [], []>} : vector<4x72xf32>, vector<72x512xf32>, vector<4x512xf32> -> vector<4x512xf32>
    %c0_74 = arith.constant 0 : index
    %c0_75 = arith.constant 0 : index
    %50 = vector.load %arg4[%c0_74, %c0_75] : memref<4x1xf32, #tpu.memory_space<vmem>>, vector<4x1xf32>
    %51 = vector.broadcast %50 : vector<4x1xf32> to vector<4x512xf32>
    %52 = arith.addf %49, %51 : vector<4x512xf32>
    %cst_76 = arith.constant 0.000000e+00 : f32
    %53 = vector.broadcast %cst_76 : f32 to vector<4x512xf32>
    %54 = arith.maximumf %52, %53 : vector<4x512xf32>
    %55 = vector.extract_strided_slice %54 {offsets = [0, 0], sizes = [1, 512], strides = [1, 1]} : vector<4x512xf32> to vector<1x512xf32>
    %c0_77 = arith.constant 0 : index
    %c0_78 = arith.constant 0 : index
    %56 = vector.load %arg5[%c0_77, %c0_78] : memref<512x64xf32, #tpu.memory_space<vmem>>, vector<512x64xf32>
    %cst_79 = arith.constant dense<0.000000e+00> : vector<1x64xf32>
    %57 = tpu.matmul %55, %56, %cst_79 {dimension_numbers = #tpu.dot_dimension_numbers<[1], [0], [0], [1], [0, 0, 1, 1], [], []>} : vector<1x512xf32>, vector<512x64xf32>, vector<1x64xf32> -> vector<1x64xf32>
    %58 = vector.extract_strided_slice %57 {offsets = [0, 0], sizes = [1, 32], strides = [1, 1]} : vector<1x64xf32> to vector<1x32xf32>
    %cst_80 = arith.constant 2.000000e+00 : f32
    %59 = vector.broadcast %cst_80 : f32 to vector<1x32xf32>
    %60 = arith.mulf %58, %59 : vector<1x32xf32>
    %61 = math.roundeven %60 : vector<1x32xf32>
    %cst_81 = arith.constant 5.000000e-01 : f32
    %62 = vector.broadcast %cst_81 : f32 to vector<1x32xf32>
    %63 = arith.mulf %61, %62 : vector<1x32xf32>
    %64 = vector.extract_strided_slice %57 {offsets = [0, 32], sizes = [1, 32], strides = [1, 1]} : vector<1x64xf32> to vector<1x32xf32>
    %cst_82 = arith.constant 2.000000e+00 : f32
    %65 = vector.broadcast %cst_82 : f32 to vector<1x32xf32>
    %66 = arith.mulf %64, %65 : vector<1x32xf32>
    %67 = math.roundeven %66 : vector<1x32xf32>
    %cst_83 = arith.constant 5.000000e-01 : f32
    %68 = vector.broadcast %cst_83 : f32 to vector<1x32xf32>
    %69 = arith.mulf %67, %68 : vector<1x32xf32>
    %cst_84 = arith.constant 3.000000e+00 : f32
    %70 = vector.broadcast %cst_84 : f32 to vector<1x32xf32>
    %71 = arith.addf %63, %70 : vector<1x32xf32>
    %72 = arith.mulf %71, %71 : vector<1x32xf32>
    %73 = arith.mulf %69, %69 : vector<1x32xf32>
    %74 = arith.addf %72, %73 : vector<1x32xf32>
    %cst_85 = arith.constant 0.000000e+00 : f32
    %75 = vector.broadcast %cst_85 : f32 to vector<1x32xf32>
    %cst_86 = arith.constant -1.000000e+00 : f32
    %76 = vector.broadcast %cst_86 : f32 to vector<1x32xf32>
    %77 = arith.subf %63, %76 : vector<1x32xf32>
    %78 = arith.mulf %77, %77 : vector<1x32xf32>
    %79 = arith.mulf %69, %69 : vector<1x32xf32>
    %80 = arith.addf %78, %79 : vector<1x32xf32>
    %81 = arith.cmpf ogt, %80, %74 : vector<1x32xf32>
    %cst_87 = arith.constant 1.000000e+00 : f32
    %82 = vector.broadcast %cst_87 : f32 to vector<1x32xf32>
    %83 = arith.select %81, %82, %75 : vector<1x32xi1>, vector<1x32xf32>
    %84 = arith.select %81, %80, %74 : vector<1x32xi1>, vector<1x32xf32>
    %cst_88 = arith.constant 1.000000e+00 : f32
    %85 = vector.broadcast %cst_88 : f32 to vector<1x32xf32>
    %86 = arith.subf %63, %85 : vector<1x32xf32>
    %87 = arith.mulf %86, %86 : vector<1x32xf32>
    %88 = arith.mulf %69, %69 : vector<1x32xf32>
    %89 = arith.addf %87, %88 : vector<1x32xf32>
    %90 = arith.cmpf ogt, %89, %84 : vector<1x32xf32>
    %cst_89 = arith.constant 2.000000e+00 : f32
    %91 = vector.broadcast %cst_89 : f32 to vector<1x32xf32>
    %92 = arith.select %90, %91, %83 : vector<1x32xi1>, vector<1x32xf32>
    %93 = arith.select %90, %89, %84 : vector<1x32xi1>, vector<1x32xf32>
    %cst_90 = arith.constant 3.000000e+00 : f32
    %94 = vector.broadcast %cst_90 : f32 to vector<1x32xf32>
    %95 = arith.subf %63, %94 : vector<1x32xf32>
    %96 = arith.mulf %95, %95 : vector<1x32xf32>
    %97 = arith.mulf %69, %69 : vector<1x32xf32>
    %98 = arith.addf %96, %97 : vector<1x32xf32>
    %99 = arith.cmpf ogt, %98, %93 : vector<1x32xf32>
    %cst_91 = arith.constant 3.000000e+00 : f32
    %100 = vector.broadcast %cst_91 : f32 to vector<1x32xf32>
    %101 = arith.select %99, %100, %92 : vector<1x32xi1>, vector<1x32xf32>
    %cst_92 = arith.constant 2.000000e+00 : f32
    %102 = vector.broadcast %cst_92 : f32 to vector<1x32xf32>
    %103 = arith.mulf %102, %101 : vector<1x32xf32>
    %cst_93 = arith.constant 3.000000e+00 : f32
    %104 = vector.broadcast %cst_93 : f32 to vector<1x32xf32>
    %105 = arith.subf %103, %104 : vector<1x32xf32>
    %c0_94 = arith.constant 0 : index
    %c0_95 = arith.constant 0 : index
    %106 = vector.load %arg6[%c0_94, %c0_95] : memref<4x32xf32, #tpu.memory_space<vmem>>, vector<4x32xf32>
    %107 = vector.broadcast %105 : vector<1x32xf32> to vector<4x32xf32>
    %108 = arith.mulf %106, %107 : vector<4x32xf32>
    %c0_96 = arith.constant 0 : index
    %c0_97 = arith.constant 0 : index
    %109 = vector.load %arg7[%c0_96, %c0_97] : memref<32x256xf32, #tpu.memory_space<vmem>>, vector<32x256xf32>
    %cst_98 = arith.constant dense<0.000000e+00> : vector<4x256xf32>
    %110 = tpu.matmul %108, %109, %cst_98 {dimension_numbers = #tpu.dot_dimension_numbers<[1], [0], [0], [1], [0, 0, 1, 1], [], []>} : vector<4x32xf32>, vector<32x256xf32>, vector<4x256xf32> -> vector<4x256xf32>
    %c0_99 = arith.constant 0 : index
    %c0_100 = arith.constant 0 : index
    %111 = vector.load %arg16[%c0_99, %c0_100] : memref<4x256xf32, #tpu.memory_space<vmem>>, vector<4x256xf32>
    tpu.vector_store %arg16[%c0_99, %c0_100], %110 {strides = array<i32>} : memref<4x256xf32, #tpu.memory_space<vmem>>, vector<4x256xf32>,
    %c0_101 = arith.constant 0 : index
    %c0_102 = arith.constant 0 : index
    %112 = vector.load %arg16[%c0_101, %c0_102] : memref<4x256xf32, #tpu.memory_space<vmem>>, vector<4x192xf32>
    %c0_103 = arith.constant 0 : index
    %c0_104 = arith.constant 0 : index
    %113 = vector.load %arg14[%c0_103, %c0_104] : memref<72x576xf32, #tpu.memory_space<vmem>>, vector<4x192xf32>
    tpu.vector_store %arg14[%c0_103, %c0_104], %112 {strides = array<i32>} : memref<72x576xf32, #tpu.memory_space<vmem>>, vector<4x192xf32>,
    %c0_105 = arith.constant 0 : index
    %c1_106 = arith.constant 1 : index
    %114 = vector.load %arg16[%c0_105, %c1_106] : memref<4x256xf32, #tpu.memory_space<vmem>>, vector<4x192xf32>
    %c8_107 = arith.constant 8 : index
    %c0_108 = arith.constant 0 : index
    %115 = vector.load %arg14[%c8_107, %c0_108] : memref<72x576xf32, #tpu.memory_space<vmem>>, vector<4x192xf32>
    tpu.vector_store %arg14[%c8_107, %c0_108], %114 {strides = array<i32>} : memref<72x576xf32, #tpu.memory_space<vmem>>, vector<4x192xf32>,
    %c0_109 = arith.constant 0 : index
    %c2_110 = arith.constant 2 : index
    %116 = vector.load %arg16[%c0_109, %c2_110] : memref<4x256xf32, #tpu.memory_space<vmem>>, vector<4x192xf32>
    %c16_111 = arith.constant 16 : index
    %c0_112 = arith.constant 0 : index
    %117 = vector.load %arg14[%c16_111, %c0_112] : memref<72x576xf32, #tpu.memory_space<vmem>>, vector<4x192xf32>
    tpu.vector_store %arg14[%c16_111, %c0_112], %116 {strides = array<i32>} : memref<72x576xf32, #tpu.memory_space<vmem>>, vector<4x192xf32>,
    %c0_113 = arith.constant 0 : index
    %c8_114 = arith.constant 8 : index
    %118 = vector.load %arg16[%c0_113, %c8_114] : memref<4x256xf32, #tpu.memory_space<vmem>>, vector<4x192xf32>
    %c24_115 = arith.constant 24 : index
    %c0_116 = arith.constant 0 : index
    %119 = vector.load %arg14[%c24_115, %c0_116] : memref<72x576xf32, #tpu.memory_space<vmem>>, vector<4x192xf32>
    tpu.vector_store %arg14[%c24_115, %c0_116], %118 {strides = array<i32>} : memref<72x576xf32, #tpu.memory_space<vmem>>, vector<4x192xf32>,
    %c0_117 = arith.constant 0 : index
    %c9 = arith.constant 9 : index
    %120 = vector.load %arg16[%c0_117, %c9] : memref<4x256xf32, #tpu.memory_space<vmem>>, vector<4x192xf32>
    %c32_118 = arith.constant 32 : index
    %c0_119 = arith.constant 0 : index
    %121 = vector.load %arg14[%c32_118, %c0_119] : memref<72x576xf32, #tpu.memory_space<vmem>>, vector<4x192xf32>
    tpu.vector_store %arg14[%c32_118, %c0_119], %120 {strides = array<i32>} : memref<72x576xf32, #tpu.memory_space<vmem>>, vector<4x192xf32>,
    %c0_120 = arith.constant 0 : index
    %c10 = arith.constant 10 : index
    %122 = vector.load %arg16[%c0_120, %c10] : memref<4x256xf32, #tpu.memory_space<vmem>>, vector<4x192xf32>
    %c40_121 = arith.constant 40 : index
    %c0_122 = arith.constant 0 : index
    %123 = vector.load %arg14[%c40_121, %c0_122] : memref<72x576xf32, #tpu.memory_space<vmem>>, vector<4x192xf32>
    tpu.vector_store %arg14[%c40_121, %c0_122], %122 {strides = array<i32>} : memref<72x576xf32, #tpu.memory_space<vmem>>, vector<4x192xf32>,
    %c0_123 = arith.constant 0 : index
    %c16_124 = arith.constant 16 : index
    %124 = vector.load %arg16[%c0_123, %c16_124] : memref<4x256xf32, #tpu.memory_space<vmem>>, vector<4x192xf32>
    %c48_125 = arith.constant 48 : index
    %c0_126 = arith.constant 0 : index
    %125 = vector.load %arg14[%c48_125, %c0_126] : memref<72x576xf32, #tpu.memory_space<vmem>>, vector<4x192xf32>
    tpu.vector_store %arg14[%c48_125, %c0_126], %124 {strides = array<i32>} : memref<72x576xf32, #tpu.memory_space<vmem>>, vector<4x192xf32>,
    %c0_127 = arith.constant 0 : index
    %c17_128 = arith.constant 17 : index
    %126 = vector.load %arg16[%c0_127, %c17_128] : memref<4x256xf32, #tpu.memory_space<vmem>>, vector<4x192xf32>
    %c56_129 = arith.constant 56 : index
    %c0_130 = arith.constant 0 : index
    %127 = vector.load %arg14[%c56_129, %c0_130] : memref<72x576xf32, #tpu.memory_space<vmem>>, vector<4x192xf32>
    tpu.vector_store %arg14[%c56_129, %c0_130], %126 {strides = array<i32>} : memref<72x576xf32, #tpu.memory_space<vmem>>, vector<4x192xf32>,
    %c0_131 = arith.constant 0 : index
    %c18_132 = arith.constant 18 : index
    %128 = vector.load %arg16[%c0_131, %c18_132] : memref<4x256xf32, #tpu.memory_space<vmem>>, vector<4x192xf32>
    %c64_133 = arith.constant 64 : index
    %c0_134 = arith.constant 0 : index
    %129 = vector.load %arg14[%c64_133, %c0_134] : memref<72x576xf32, #tpu.memory_space<vmem>>, vector<4x192xf32>
    tpu.vector_store %arg14[%c64_133, %c0_134], %128 {strides = array<i32>} : memref<72x576xf32, #tpu.memory_space<vmem>>, vector<4x192xf32>,
    %c0_135 = arith.constant 0 : index
    %c0_136 = arith.constant 0 : index
    %130 = vector.load %arg9[%c0_135, %c0_136] : memref<8x72xf32, #tpu.memory_space<vmem>>, vector<8x72xf32>
    %c0_137 = arith.constant 0 : index
    %c0_138 = arith.constant 0 : index
    %131 = vector.load %arg14[%c0_137, %c0_138] : memref<72x576xf32, #tpu.memory_space<vmem>>, vector<72x192xf32>
    %cst_139 = arith.constant dense<0.000000e+00> : vector<8x192xf32>
    %132 = tpu.matmul %130, %131, %cst_139 {dimension_numbers = #tpu.dot_dimension_numbers<[1], [0], [0], [1], [0, 0, 1, 1], [], []>} : vector<8x72xf32>, vector<72x192xf32>, vector<8x192xf32> -> vector<8x192xf32>
    %c0_140 = arith.constant 0 : index
    %c0_141 = arith.constant 0 : index
    %133 = vector.load %arg10[%c0_140, %c0_141] : memref<8x1xf32, #tpu.memory_space<vmem>>, vector<8x1xf32>
    %134 = vector.broadcast %133 : vector<8x1xf32> to vector<8x192xf32>
    %135 = arith.addf %132, %134 : vector<8x192xf32>
    %cst_142 = arith.constant 0.000000e+00 : f32
    %136 = vector.broadcast %cst_142 : f32 to vector<8x192xf32>
    %137 = arith.maximumf %135, %136 : vector<8x192xf32>
    %c0_143 = arith.constant 0 : index
    %c0_144 = arith.constant 0 : index
    %138 = vector.load %arg8[%c0_143, %c0_144] : memref<1x192xf32, #tpu.memory_space<vmem>>, vector<1x192xf32>
    %139 = vector.broadcast %138 : vector<1x192xf32> to vector<8x192xf32>
    %140 = arith.mulf %137, %139 : vector<8x192xf32>
    %c0_145 = arith.constant 0 : index
    %c0_146 = arith.constant 0 : index
    %141 = vector.load %arg17[%c0_145, %c0_146] : memref<8x192xf32, #tpu.memory_space<vmem>>, vector<8x192xf32>
    tpu.vector_store %arg17[%c0_145, %c0_146], %140 {strides = array<i32>} : memref<8x192xf32, #tpu.memory_space<vmem>>, vector<8x192xf32>,
    %c0_147 = arith.constant 0 : index
    %c0_148 = arith.constant 0 : index
    %142 = vector.load %arg17[%c0_147, %c0_148] : memref<8x192xf32, #tpu.memory_space<vmem>>, vector<8x128xf32>
    %c0_149 = arith.constant 0 : index
    %c0_150 = arith.constant 0 : index
    %143 = vector.load %arg14[%c0_149, %c0_150] : memref<72x576xf32, #tpu.memory_space<vmem>>, vector<8x128xf32>
    tpu.vector_store %arg14[%c0_149, %c0_150], %142 {strides = array<i32>} : memref<72x576xf32, #tpu.memory_space<vmem>>, vector<8x128xf32>,
    %c0_151 = arith.constant 0 : index
    %c1_152 = arith.constant 1 : index
    %144 = vector.load %arg17[%c0_151, %c1_152] : memref<8x192xf32, #tpu.memory_space<vmem>>, vector<8x128xf32>
    %c8_153 = arith.constant 8 : index
    %c0_154 = arith.constant 0 : index
    %145 = vector.load %arg14[%c8_153, %c0_154] : memref<72x576xf32, #tpu.memory_space<vmem>>, vector<8x128xf32>
    tpu.vector_store %arg14[%c8_153, %c0_154], %144 {strides = array<i32>} : memref<72x576xf32, #tpu.memory_space<vmem>>, vector<8x128xf32>,
    %c0_155 = arith.constant 0 : index
    %c2_156 = arith.constant 2 : index
    %146 = vector.load %arg17[%c0_155, %c2_156] : memref<8x192xf32, #tpu.memory_space<vmem>>, vector<8x128xf32>
    %c16_157 = arith.constant 16 : index
    %c0_158 = arith.constant 0 : index
    %147 = vector.load %arg14[%c16_157, %c0_158] : memref<72x576xf32, #tpu.memory_space<vmem>>, vector<8x128xf32>
    tpu.vector_store %arg14[%c16_157, %c0_158], %146 {strides = array<i32>} : memref<72x576xf32, #tpu.memory_space<vmem>>, vector<8x128xf32>,
    %c0_159 = arith.constant 0 : index
    %c8_160 = arith.constant 8 : index
    %148 = vector.load %arg17[%c0_159, %c8_160] : memref<8x192xf32, #tpu.memory_space<vmem>>, vector<8x128xf32>
    %c24_161 = arith.constant 24 : index
    %c0_162 = arith.constant 0 : index
    %149 = vector.load %arg14[%c24_161, %c0_162] : memref<72x576xf32, #tpu.memory_space<vmem>>, vector<8x128xf32>
    tpu.vector_store %arg14[%c24_161, %c0_162], %148 {strides = array<i32>} : memref<72x576xf32, #tpu.memory_space<vmem>>, vector<8x128xf32>,
    %c0_163 = arith.constant 0 : index
    %c9_164 = arith.constant 9 : index
    %150 = vector.load %arg17[%c0_163, %c9_164] : memref<8x192xf32, #tpu.memory_space<vmem>>, vector<8x128xf32>
    %c32_165 = arith.constant 32 : index
    %c0_166 = arith.constant 0 : index
    %151 = vector.load %arg14[%c32_165, %c0_166] : memref<72x576xf32, #tpu.memory_space<vmem>>, vector<8x128xf32>
    tpu.vector_store %arg14[%c32_165, %c0_166], %150 {strides = array<i32>} : memref<72x576xf32, #tpu.memory_space<vmem>>, vector<8x128xf32>,
    %c0_167 = arith.constant 0 : index
    %c10_168 = arith.constant 10 : index
    %152 = vector.load %arg17[%c0_167, %c10_168] : memref<8x192xf32, #tpu.memory_space<vmem>>, vector<8x128xf32>
    %c40_169 = arith.constant 40 : index
    %c0_170 = arith.constant 0 : index
    %153 = vector.load %arg14[%c40_169, %c0_170] : memref<72x576xf32, #tpu.memory_space<vmem>>, vector<8x128xf32>
    tpu.vector_store %arg14[%c40_169, %c0_170], %152 {strides = array<i32>} : memref<72x576xf32, #tpu.memory_space<vmem>>, vector<8x128xf32>,
    %c0_171 = arith.constant 0 : index
    %c16_172 = arith.constant 16 : index
    %154 = vector.load %arg17[%c0_171, %c16_172] : memref<8x192xf32, #tpu.memory_space<vmem>>, vector<8x128xf32>
    %c48_173 = arith.constant 48 : index
    %c0_174 = arith.constant 0 : index
    %155 = vector.load %arg14[%c48_173, %c0_174] : memref<72x576xf32, #tpu.memory_space<vmem>>, vector<8x128xf32>
    tpu.vector_store %arg14[%c48_173, %c0_174], %154 {strides = array<i32>} : memref<72x576xf32, #tpu.memory_space<vmem>>, vector<8x128xf32>,
    %c0_175 = arith.constant 0 : index
    %c17_176 = arith.constant 17 : index
    %156 = vector.load %arg17[%c0_175, %c17_176] : memref<8x192xf32, #tpu.memory_space<vmem>>, vector<8x128xf32>
    %c56_177 = arith.constant 56 : index
    %c0_178 = arith.constant 0 : index
    %157 = vector.load %arg14[%c56_177, %c0_178] : memref<72x576xf32, #tpu.memory_space<vmem>>, vector<8x128xf32>
    tpu.vector_store %arg14[%c56_177, %c0_178], %156 {strides = array<i32>} : memref<72x576xf32, #tpu.memory_space<vmem>>, vector<8x128xf32>,
    %c0_179 = arith.constant 0 : index
    %c18_180 = arith.constant 18 : index
    %158 = vector.load %arg17[%c0_179, %c18_180] : memref<8x192xf32, #tpu.memory_space<vmem>>, vector<8x128xf32>
    %c64_181 = arith.constant 64 : index
    %c0_182 = arith.constant 0 : index
    %159 = vector.load %arg14[%c64_181, %c0_182] : memref<72x576xf32, #tpu.memory_space<vmem>>, vector<8x128xf32>
    tpu.vector_store %arg14[%c64_181, %c0_182], %158 {strides = array<i32>} : memref<72x576xf32, #tpu.memory_space<vmem>>, vector<8x128xf32>,
    %c0_183 = arith.constant 0 : index
    %c0_184 = arith.constant 0 : index
    %160 = vector.load %arg11[%c0_183, %c0_184] : memref<3x72xf32, #tpu.memory_space<vmem>>, vector<3x72xf32>
    %c0_185 = arith.constant 0 : index
    %c0_186 = arith.constant 0 : index
    %161 = vector.load %arg14[%c0_185, %c0_186] : memref<72x576xf32, #tpu.memory_space<vmem>>, vector<72x128xf32>
    %cst_187 = arith.constant dense<0.000000e+00> : vector<3x128xf32>
    %162 = tpu.matmul %160, %161, %cst_187 {dimension_numbers = #tpu.dot_dimension_numbers<[1], [0], [0], [1], [0, 0, 1, 1], [], []>} : vector<3x72xf32>, vector<72x128xf32>, vector<3x128xf32> -> vector<3x128xf32>
    %c0_188 = arith.constant 0 : index
    %c0_189 = arith.constant 0 : index
    %163 = vector.load %arg12[%c0_188, %c0_189] : memref<3x1xf32, #tpu.memory_space<vmem>>, vector<3x1xf32>
    %164 = vector.broadcast %163 : vector<3x1xf32> to vector<3x128xf32>
    %165 = arith.addf %162, %164 : vector<3x128xf32>
    %cst_190 = arith.constant 0.000000e+00 : f32
    %166 = vector.broadcast %cst_190 : f32 to vector<3x128xf32>
    %167 = arith.maximumf %165, %166 : vector<3x128xf32>
    %c0_191 = arith.constant 0 : index
    %c0_192 = arith.constant 0 : index
    %168 = vector.load %arg13[%c0_191, %c0_192] : memref<3x128xf32, #tpu.memory_space<vmem>>, vector<3x128xf32>
    tpu.vector_store %arg13[%c0_191, %c0_192], %167 {strides = array<i32>} : memref<3x128xf32, #tpu.memory_space<vmem>>, vector<3x128xf32>,
    return
  }
}

</mosaic_0001>

<bundles_post_ra>
// kernel: autoencoder_forward.1
= control target key start
LH: loop header
LB: loop body
LE: loop exit
PB: predicated region body
PF: predicated region fallthrough
CT: control target
= control target key end

     0   :  { %18 = vsyncpa [#allocation7], 0  ;;  %s2238_s25 = smov [#allocation6]   ;;  %s2895_s0 = inlined_call_operand.vmem [shape: f32[3,640], index: 0, kind: input, shape index: {}]   ;;  %s2896_s1 = inlined_call_operand.vmem [shape: f32[8,72], index: 1, kind: input, shape index: {}]   ;;  %s2897_s2 = inlined_call_operand.vmem [shape: f32[8,1], index: 2, kind: input, shape index: {}]   ;;  %s2898_s3 = inlined_call_operand.vmem [shape: f32[4,72], index: 3, kind: input, shape index: {}]   ;;  %s2899_s4 = inlined_call_operand.vmem [shape: f32[4,1], index: 4, kind: input, shape index: {}]   ;;  %s2900_s5 = inlined_call_operand.hbm [shape: f32[512,64], index: 5, kind: input, shape index: {}]   ;;  %s2901_s6 = inlined_call_operand.vmem [shape: f32[4,32], index: 6, kind: input, shape index: {}]   ;;  %s2902_s7 = inlined_call_operand.vmem [shape: f32[32,256], index: 7, kind: input, shape index: {}]   ;;  %s2903_s8 = inlined_call_operand.vmem [shape: f32[1,192], index: 8, kind: input, shape index: {}]   ;;  %s2904_s9 = inlined_call_operand.vmem [shape: f32[8,72], index: 9, kind: input, shape index: {}]   ;;  %s2905_s10 = inlined_call_operand.vmem [shape: f32[8,1], index: 10, kind: input, shape index: {}]   ;;  %s2906_s11 = inlined_call_operand.vmem [shape: f32[3,72], index: 11, kind: input, shape index: {}]   ;;  %s2907_s12 = inlined_call_operand.vmem [shape: f32[3,1], index: 12, kind: input, shape index: {}]   ;;  %s2908_s13 = inlined_call_operand.vmem [shape: f32[3,128], index: 13, kind: output, shape index: {}]  }
   0x1   :  { %s34_s26 = sshll.u32 %s2238_s25, 4  ;;  %s2214_s29 = scalar_lea.hbm %s2900_s5, 8192  ;;  %s35_s26 = int_to_ptr.vmem [resolvable:$true] %s34_s26 }
   0x2   :  { %p2215_p0 = scmp.ne.s32.totalorder %s2900_s5, %s2214_s29  ;;  %p2218_p1 = scmp.lt.u32.totalorder %s2214_s29, %s2900_s5 }
   0x4   :  { %p2220_p2 = pnand %p2218_p1, %p2215_p0 }
   0x6   :  { %2223 = shalt.err (!%p2220_p2)
}
   0x7   :  { %s2224_s17 = scalar_lea.vmem %s35_s26, 8192  ;;  %p2229_p4 = scmp.lt.s32.totalorder %s35_s26, %s35_s26 }
   0x8   :  { %p2225_p3 = scmp.ne.s32.totalorder %s35_s26, %s2224_s17  ;;  %p2230_p5 = scmp.lt.s32.totalorder %s2224_s17, %s2224_s17 }
   0xa   :  { %p2231_p6 = por %p2230_p5, %p2229_p4 }
   0xc   :  { %p2232_p7 = pnand %p2231_p6, %p2225_p3 }
   0xe   :  { %2235 = shalt.err (!%p2232_p7)
}
   0xf   :  { %s2239_s18 = smov 128   ;;  %s2240_s19 = smov 8  }
  0x10   :  { %40 = dma.hbm_to_vmem [thread:$0]  %s2900_s5, 8192, %s35_s26, [#allocation7], %s2239_s18, %s2239_s18, %s2240_s19  }
  0x11   :  { %2236 = dma.done.wait [#allocation7], 8192  }
  0x12   :  { %2237 = vsyncadd [#allocation7], 4294959104  ;;  %v2241_v0 = vmov 0.0   ;;  %v2379_v1 = vld [vmem:[%s2895_s0 + $0x8] sm:$0x77]  ;;  %s2242_s25 = smov 127  }
  0x13   :  { %70 = vst [vmem:[#allocation2 + $0x58] sm:$0xff] %v2241_v0  ;;  %58 = vst [vmem:[#allocation2] sm:$0xff] %v2241_v0  ;;  %503 = vmatprep.mubr.f32.mxu0 %v2241_v0  ;;  %574 = vmatprep.mubr.f32.mxu1 %v2241_v0  ;;  %v119_v2 = vld [vmem:[%s2895_s0] sm:$0x77]  ;;  %v2393_v4 = vld [vmem:[%s2895_s0 + $0x8] sm:$0x77]  ;;  %v126_v27 = vcombine.high %v2379_v1, %v2379_v1 }
  0x14   :  { %59 = vst [vmem:[#allocation2 + $0x8] sm:$0xff] %v2241_v0  ;;  %60 = vst [vmem:[#allocation2 + $0x10] sm:$0xff] %v2241_v0  ;;  %131 = vrot.lane.b32.xlu0 %v2379_v1, %s2242_s25  ;;  %127 = vrot.lane.b32.xlu1 %v119_v2, %s2242_s25  ;;  %v152_v3 = vld [vmem:[%s2895_s0] sm:$0x77]  ;;  %v125_v7 = vcombine.high %v119_v2, %v119_v2  ;;  %s2243_s15 = smov 126   ;;  %s2244_s16 = smov 112   ;;  %v159_v32 = vcombine.high %v2393_v4, %v2393_v4 }
  0x15   :  { %61 = vst [vmem:[#allocation2 + $0x18] sm:$0xff] %v2241_v0  ;;  %64 = vst [vmem:[#allocation2 + $0x28] sm:$0xff] %v2241_v0  ;;  %v158_v5 = vcombine.high %v152_v3, %v152_v3  ;;  %v185_v6 = vld [vmem:[%s2895_s0] sm:$0x77]  ;;  %v2409_v10 = vld [vmem:[%s2895_s0 + $0x8] sm:$0x77] }
  0x16   :  { %65 = vst [vmem:[#allocation2 + $0x30] sm:$0xff] %v2241_v0  ;;  %66 = vst [vmem:[#allocation2 + $0x38] sm:$0xff] %v2241_v0  ;;  %v191_v8 = vcombine.high %v185_v6, %v185_v6  ;;  %v104_v9 = vld [vmem:[%s2895_s0] sm:$0x77]  ;;  %s2245_s24 = smov 111   ;;  %s2246_s28 = smov 110   ;;  %v192_v34 = vcombine.high %v2409_v10, %v2409_v10 }
  0x17   :  { %67 = vst [vmem:[#allocation2 + $0x40] sm:$0xff] %v2241_v0  ;;  %69 = vst [vmem:[#allocation2 + $0x50] sm:$0xff] %v2241_v0  ;;  %v218_v11 = vld [vmem:[%s2895_s0] sm:$0x77]  ;;  %v109_v12 = vcombine.high %v104_v9, %v104_v9  ;;  %v219_v16 = vld [vmem:[%s2895_s0 + $0x8] sm:$0x77] }
  0x18   :  { %71 = vst [vmem:[#allocation2 + $0x60] sm:$0xff] %v2241_v0  ;;  %72 = vst [vmem:[#allocation2 + $0x68] sm:$0xff] %v2241_v0  ;;  %164 = vrot.lane.b32.xlu0 %v2393_v4, %s2243_s15  ;;  %162 = vrot.lane.b32.xlu1 %v158_v5, %s2243_s15  ;;  %v224_v13 = vcombine.high %v218_v11, %v218_v11  ;;  %v251_v14 = vld [vmem:[%s2895_s0] sm:$0x77]  ;;  %v252_v17 = vld [vmem:[%s2895_s0 + $0x8] sm:$0x77]  ;;  %v225_v36 = vcombine.high %v219_v16, %v219_v16 }
  0x19   :  { %74 = vst [vmem:[#allocation2 + $0x78] sm:$0xff] %v2241_v0  ;;  %75 = vst [vmem:[#allocation2 + $0x80] sm:$0xff] %v2241_v0  ;;  %v257_v15 = vcombine.high %v251_v14, %v251_v14  ;;  %v284_v18 = vld [vmem:[%s2895_s0] sm:$0x77]  ;;  %v105_v21 = vld [vmem:[%s2895_s0 + $0x8] sm:$0x77]  ;;  %v258_v38 = vcombine.high %v252_v17, %v252_v17 }
  0x1a   :  { %76 = vst [vmem:[#allocation2 + $0x88] sm:$0xff] %v2241_v0  ;;  %77 = vst [vmem:[#allocation2 + $0x90] sm:$0xff] %v2241_v0  ;;  %v290_v19 = vcombine.high %v284_v18, %v284_v18  ;;  %v317_v20 = vld [vmem:[%s2895_s0] sm:$0x77]  ;;  %s2247_s5 = smov 96   ;;  %vm62_vm0 = vcmask 523264   ;;  %v110_v24 = vcombine.high %v105_v21, %v105_v21 }
  0x1b   :  { %79 = vst [vmem:[#allocation2 + $0xa0] sm:$0xff] %v2241_v0  ;;  %80 = vst [vmem:[#allocation2 + $0xa8] sm:$0xff] %v2241_v0  ;;  %v323_v22 = vcombine.high %v317_v20, %v317_v20  ;;  %v285_v23 = vld [vmem:[%s2895_s0 + $0x8] sm:$0x77]  ;;  %vm117_vm1 = vcmask 518144   ;;  %s2248_s29 = smov 95  }
  0x1c   :  { %81 = vst [vmem:[#allocation2 + $0xb0] sm:$0xff] %v2241_v0  ;;  %82 = vst [vmem:[#allocation2 + $0xb8] sm:$0xff] %v2241_v0  ;;  %195 = vrot.lane.b32.xlu1 %v191_v8, %s2244_s16  ;;  %129 = vrot.lane.b32.xlu0 %v125_v7, %s2242_s25  ;;  %v106_v25 = vld [vmem:[%s2895_s0 + $0x10] sm:$0x7]  ;;  %v318_v26 = vld [vmem:[%s2895_s0 + $0x8] sm:$0x77]  ;;  %v291_v40 = vcombine.high %v285_v23, %v285_v23 }
  0x1d   :  { %84 = vst [vmem:[#allocation2 + $0xc8] sm:$0xff] %v2241_v0  ;;  %85 = vst [vmem:[#allocation2 + $0xd0] sm:$0xff] %v2241_v0  ;;  %v350_v28 = vld [vmem:[%s2895_s0] sm:$0x77]  ;;  %v121_v30 = vld [vmem:[%s2895_s0 + $0x10] sm:$0x7]  ;;  %v324_v42 = vcombine.high %v318_v26, %v318_v26 }
  0x1e   :  { %86 = vst [vmem:[#allocation2 + $0xd8] sm:$0xff] %v2241_v0  ;;  %87 = vst [vmem:[#allocation2 + $0xe0] sm:$0xff] %v2241_v0  ;;  %v356_v29 = vcombine.high %v350_v28, %v350_v28  ;;  %s2249_s21 = smov 94   ;;  %v351_v31 = vld [vmem:[%s2895_s0 + $0x8] sm:$0x77]  ;;  %v2250_v46 = vmov 0  }
  0x1f   :  { %89 = vst [vmem:[#allocation2 + $0xf0] sm:$0xff] %v2241_v0  ;;  %90 = vst [vmem:[#allocation2 + $0xf8] sm:$0xff] %v2241_v0  ;;  %v154_v33 = vld [vmem:[%s2895_s0 + $0x10] sm:$0x7]  ;;  %v357_v44 = vcombine.high %v351_v31, %v351_v31  ;;  %2194 = vset.pattern.permute.xlu0 %v2250_v46  ;;  %v429_v47 = vld [vmem:[%s2897_s2] sm:$0xff]  ;;  %2195 = vset.pattern.permute.xlu1 %v2250_v46  ;;  %vm170_vm2 = vcmask 1031168  }
  0x20   :  { %91 = vst [vmem:[#allocation2 + $0x100] sm:$0xff] %v2241_v0  ;;  %92 = vst [vmem:[#allocation2 + $0x108] sm:$0xff] %v2241_v0  ;;  %160 = vrot.lane.b32.xlu1 %v152_v3, %s2243_s15  ;;  %197 = vrot.lane.b32.xlu0 %v2409_v10, %s2244_s16  ;;  %v187_v35 = vld [vmem:[%s2895_s0 + $0x10] sm:$0x7]  ;;  %vm137_vm3 = vcmask 1039360   ;;  %vm203_vm4 = vcmask 916480  }
  0x21   :  { %94 = vst [vmem:[#allocation2 + $0x118] sm:$0xff] %v2241_v0  ;;  %95 = vst [vmem:[#allocation2 + $0x120] sm:$0xff] %v2241_v0  ;;  %v220_v37 = vld [vmem:[%s2895_s0 + $0x10] sm:$0x7]  ;;  %vm236_vm5 = vcmask 908288   ;;  %vm269_vm6 = vcmask 900096  }
  0x22   :  { %96 = vst [vmem:[#allocation2 + $0x128] sm:$0xff] %v2241_v0  ;;  %97 = vst [vmem:[#allocation2 + $0x130] sm:$0xff] %v2241_v0  ;;  %v253_v39 = vld [vmem:[%s2895_s0 + $0x10] sm:$0x7]  ;;  %vm302_vm7 = vcmask 785408   ;;  %vm335_vm8 = vcmask 777216  }
  0x23   :  { %99 = vst [vmem:[#allocation2 + $0x140] sm:$0xff] %v2241_v0  ;;  %100 = vst [vmem:[#allocation2 + $0x148] sm:$0xff] %v2241_v0  ;;  %v286_v41 = vld [vmem:[%s2895_s0 + $0x10] sm:$0x7]  ;;  %vm368_vm9 = vcmask 769024   ;;  %vm435_vm10 = vcmask 588800  }
  0x24   :  { %101 = vst [vmem:[#allocation2 + $0x150] sm:$0xff] %v2241_v0  ;;  %102 = vst [vmem:[#allocation2 + $0x158] sm:$0xff] %v2241_v0  ;;  %228 = vrot.lane.b32.xlu1 %v224_v13, %s2245_s24  ;;  %193 = vrot.lane.b32.xlu0 %v185_v6, %s2244_s16  ;;  %v319_v43 = vld [vmem:[%s2895_s0 + $0x10] sm:$0x7]  ;;  %vm2252_vm11 = vmmov 0   ;;  %vm1365_vm15 = vcmask 261120  }
  0x25   :  { %113 = vst [vmem:[#allocation2] sm:$0x7] %v104_v9  ;;  %114 = vst [vmem:[#allocation2 + $0x8] sm:$0x7] %v109_v12  ;;  %v352_v45 = vld [vmem:[%s2895_s0 + $0x10] sm:$0x7] }
  0x26   :  { %115 = vst [vmem:[#allocation2 + $0x10] sm:$0x7] %v105_v21  ;;  %68 = vst.msk [vmem:[#allocation2 + $0x48] sm:$0xff] %vm62_vm0, %v2241_v0 }
  0x27   :  { %63 = vst.msk [vmem:[#allocation2 + $0x20] sm:$0xff] %vm62_vm0, %v2241_v0  ;;  %73 = vst.msk [vmem:[#allocation2 + $0x70] sm:$0xff] %vm62_vm0, %v2241_v0 }
  0x28   :  { %261 = vrot.lane.b32.xlu1 %v257_v15, %s2246_s28  ;;  %230 = vrot.lane.b32.xlu0 %v219_v16, %s2245_s24  ;;  %78 = vst.msk [vmem:[#allocation2 + $0x98] sm:$0xff] %vm62_vm0, %v2241_v0  ;;  %83 = vst.msk [vmem:[#allocation2 + $0xc0] sm:$0xff] %vm62_vm0, %v2241_v0 }
  0x29   :  { %88 = vst.msk [vmem:[#allocation2 + $0xe8] sm:$0xff] %vm62_vm0, %v2241_v0  ;;  %93 = vst.msk [vmem:[#allocation2 + $0x110] sm:$0xff] %vm62_vm0, %v2241_v0 }
  0x2a   :  { %98 = vst.msk [vmem:[#allocation2 + $0x138] sm:$0xff] %vm62_vm0, %v2241_v0  ;;  %103 = vst.msk [vmem:[#allocation2 + $0x160] sm:$0xff] %vm62_vm0, %v2241_v0 }
  0x2b   :  { %118 = vst.msk [vmem:[#allocation2 + $0x20] sm:$0x7] %vm117_vm1, %v106_v25  ;;  %116 = vst [vmem:[#allocation2 + $0x18] sm:$0x7] %v110_v24 }
  0x2c   :  { %226 = vrot.lane.b32.xlu1 %v218_v11, %s2245_s24  ;;  %263 = vrot.lane.b32.xlu0 %v252_v17, %s2246_s28  ;;  %v385_v61 = vld [vmem:[#allocation2 + $0x8] sm:$0xff]  ;;  %v384_v62 = vld [vmem:[#allocation2] sm:$0xff] }
  0x30   :  { %294 = vrot.lane.b32.xlu1 %v290_v19, %s2247_s5  ;;  %259 = vrot.lane.b32.xlu0 %v251_v14, %s2246_s28 }
  0x34   :  { %327 = vrot.lane.b32.xlu1 %v323_v22, %s2248_s29  ;;  %296 = vrot.lane.b32.xlu0 %v285_v23, %s2247_s5 }
  0x38   :  { %292 = vrot.lane.b32.xlu1 %v284_v18, %s2247_s5  ;;  %329 = vrot.lane.b32.xlu0 %v318_v26, %s2248_s29 }
  0x3c   :  { %133 = vrot.lane.b32.xlu1 %v126_v27, %s2242_s25  ;;  %325 = vrot.lane.b32.xlu0 %v317_v20, %s2248_s29 }
  0x40   :  { %360 = vrot.lane.b32.xlu1 %v356_v29, %s2249_s21  ;;  %135 = vrot.lane.b32.xlu0 %v121_v30, %s2242_s25 }
  0x44   :  { %358 = vrot.lane.b32.xlu1 %v350_v28, %s2249_s21  ;;  %362 = vrot.lane.b32.xlu0 %v351_v31, %s2249_s21 }
  0x48   :  { %168 = vrot.lane.b32.xlu1 %v154_v33, %s2243_s15  ;;  %166 = vrot.lane.b32.xlu0 %v159_v32, %s2243_s15 }
  0x4c   :  { %201 = vrot.lane.b32.xlu1 %v187_v35, %s2244_s16  ;;  %199 = vrot.lane.b32.xlu0 %v192_v34, %s2244_s16 }
  0x50   :  { %234 = vrot.lane.b32.xlu1 %v220_v37, %s2245_s24  ;;  %232 = vrot.lane.b32.xlu0 %v225_v36, %s2245_s24 }
  0x54   :  { %267 = vrot.lane.b32.xlu1 %v253_v39, %s2246_s28  ;;  %265 = vrot.lane.b32.xlu0 %v258_v38, %s2246_s28 }
  0x58   :  { %300 = vrot.lane.b32.xlu1 %v286_v41, %s2247_s5  ;;  %298 = vrot.lane.b32.xlu0 %v291_v40, %s2247_s5 }
  0x5c   :  { %333 = vrot.lane.b32.xlu1 %v319_v43, %s2248_s29  ;;  %331 = vrot.lane.b32.xlu0 %v324_v42, %s2248_s29 }
  0x60   :  { %364 = vrot.lane.b32.xlu0 %v357_v44, %s2249_s21  ;;  %366 = vrot.lane.b32.xlu1 %v352_v45, %s2249_s21 }
  0x64   :  { %432 = vperm.xlu0 %2194, %v429_v47  }
  0x86   :  { %v2534_v48 = vpop.permute.xlu0 %131  ;;  %v128_v49 = vpop.permute.xlu1 %127 }
  0x8a   :  { %v2536_v50 = vpop.permute.xlu0 %164  ;;  %v163_v51 = vpop.permute.xlu1 %162 }
  0x8b   :  { %v172_v52 = vsel %vm170_vm2, %v163_v51, %v2536_v50 }
  0x8c   :  { %181 = vst [vmem:[#allocation2 + $0x58] sm:$0x7] %v172_v52 }
  0x8e   :  { %v196_v53 = vpop.permute.xlu1 %195  ;;  %v130_v54 = vpop.permute.xlu0 %129 }
  0x8f   :  { %v138_v55 = vsel %vm137_vm3, %v128_v49, %v130_v54  ;;  %v139_v56 = vsel %vm137_vm3, %v130_v54, %v2534_v48  ;;  %v387_v54 = vld [vmem:[#allocation2 + $0x18] sm:$0xff] }
  0x90   :  { %147 = vst [vmem:[#allocation2 + $0x28] sm:$0x7] %v138_v55  ;;  %148 = vst [vmem:[#allocation2 + $0x30] sm:$0x7] %v139_v56 }
  0x92   :  { %v161_v57 = vpop.permute.xlu1 %160  ;;  %v2543_v58 = vpop.permute.xlu0 %197 }
  0x93   :  { %v171_v59 = vsel %vm170_vm2, %v161_v57, %v163_v51  ;;  %v205_v60 = vsel %vm203_vm4, %v196_v53, %v2543_v58  ;;  %v395_v10 = vld [vmem:[#allocation2 + $0x58] sm:$0xff]  ;;  %v386_v57 = vld [vmem:[#allocation2 + $0x10] sm:$0xff] }
  0x94   :  { %180 = vst [vmem:[#allocation2 + $0x50] sm:$0x7] %v171_v59  ;;  %214 = vst [vmem:[#allocation2 + $0x80] sm:$0x7] %v205_v60 }
  0x96   :  { %v229_v63 = vpop.permute.xlu1 %228  ;;  %v194_v1 = vpop.permute.xlu0 %193 }
  0x97   :  { %v204_v2 = vsel %vm203_vm4, %v194_v1, %v196_v53  ;;  %v390_v3 = vld [vmem:[#allocation2 + $0x30] sm:$0xff]  ;;  %v389_v4 = vld [vmem:[#allocation2 + $0x28] sm:$0xff] }
  0x98   :  { %213 = vst [vmem:[#allocation2 + $0x78] sm:$0x7] %v204_v2  ;;  %v1999_v5 = vpack.c.bf16 %v390_v3, %v385_v61  ;;  %v2001_v6 = vpack.c.bf16 %v389_v4, %v384_v62  ;;  %v388_v4 = vld [vmem:[#allocation2 + $0x20] sm:$0xff] }
  0x9a   :  { %v262_v7 = vpop.permute.xlu1 %261  ;;  %v2549_v8 = vpop.permute.xlu0 %230  ;;  %2000 = vmatprep.subr.bf16.mxu0 %v1999_v5 }
  0x9b   :  { %v238_v9 = vsel %vm236_vm5, %v229_v63, %v2549_v8  ;;  %2002 = vmatpush1.bf16.msra.mxu0 %v2001_v6  ;;  %v400_v11 = vld [vmem:[#allocation2 + $0x80] sm:$0xff]  ;;  %v394_v17 = vld [vmem:[#allocation2 + $0x50] sm:$0xff] }
  0x9c   :  { %247 = vst [vmem:[#allocation2 + $0xa8] sm:$0x7] %v238_v9  ;;  %v2003_v12 = vpack.c.bf16 %v400_v11, %v395_v10  ;;  %v2589_v10 = vld [vmem:[%s2896_s1] sm:$0xff] }
  0x9e   :  { %v227_v13 = vpop.permute.xlu1 %226  ;;  %v2553_v14 = vpop.permute.xlu0 %263  ;;  %2004 = vmatprep.subr.bf16.mxu0 %v2003_v12 }
  0x9f   :  { %v237_v15 = vsel %vm236_vm5, %v227_v13, %v229_v63  ;;  %v271_v16 = vsel %vm269_vm6, %v262_v7, %v2553_v14  ;;  %v399_v18 = vld [vmem:[#allocation2 + $0x78] sm:$0xff] }
  0xa0   :  { %246 = vst [vmem:[#allocation2 + $0xa0] sm:$0x7] %v237_v15  ;;  %280 = vst [vmem:[#allocation2 + $0xd0] sm:$0x7] %v271_v16  ;;  %v2005_v19 = vpack.c.bf16 %v399_v18, %v394_v17  ;;  %v2251_v15 = vmov 0.0|0.0  }
  0xa2   :  { %v295_v20 = vpop.permute.xlu1 %294  ;;  %v260_v21 = vpop.permute.xlu0 %259  ;;  %2006 = vmatpush1.bf16.msra.mxu0 %v2005_v19 }
  0xa3   :  { %v270_v22 = vsel %vm269_vm6, %v260_v21, %v262_v7  ;;  %v405_v26 = vld [vmem:[#allocation2 + $0xa8] sm:$0xff] }
  0xa4   :  { %279 = vst [vmem:[#allocation2 + $0xc8] sm:$0x7] %v270_v22 }
  0xa6   :  { %v328_v23 = vpop.permute.xlu1 %327  ;;  %v2559_v24 = vpop.permute.xlu0 %296 }
  0xa7   :  { %v304_v25 = vsel %vm302_vm7, %v295_v20, %v2559_v24  ;;  %v410_v27 = vld [vmem:[#allocation2 + $0xd0] sm:$0xff]  ;;  %v404_v33 = vld [vmem:[#allocation2 + $0xa0] sm:$0xff] }
  0xa8   :  { %313 = vst [vmem:[#allocation2 + $0xf8] sm:$0x7] %v304_v25  ;;  %v2007_v28 = vpack.c.bf16 %v410_v27, %v405_v26 }
  0xaa   :  { %v293_v29 = vpop.permute.xlu1 %292  ;;  %v2563_v30 = vpop.permute.xlu0 %329  ;;  %2008 = vmatprep.subr.bf16.mxu0 %v2007_v28 }
  0xab   :  { %v303_v31 = vsel %vm302_vm7, %v293_v29, %v295_v20  ;;  %v337_v32 = vsel %vm335_vm8, %v328_v23, %v2563_v30  ;;  %v409_v34 = vld [vmem:[#allocation2 + $0xc8] sm:$0xff] }
  0xac   :  { %312 = vst [vmem:[#allocation2 + $0xf0] sm:$0x7] %v303_v31  ;;  %346 = vst [vmem:[#allocation2 + $0x120] sm:$0x7] %v337_v32  ;;  %v2009_v35 = vpack.c.bf16 %v409_v34, %v404_v33 }
  0xae   :  { %v134_v36 = vpop.permute.xlu1 %133  ;;  %v326_v37 = vpop.permute.xlu0 %325  ;;  %2010 = vmatpush1.bf16.msra.mxu0 %v2009_v35 }
  0xaf   :  { %v140_v38 = vsel %vm137_vm3, %v2534_v48, %v134_v36  ;;  %v336_v39 = vsel %vm335_vm8, %v326_v37, %v328_v23  ;;  %v415_v43 = vld [vmem:[#allocation2 + $0xf8] sm:$0xff] }
  0xb0   :  { %149 = vst [vmem:[#allocation2 + $0x38] sm:$0x7] %v140_v38  ;;  %345 = vst [vmem:[#allocation2 + $0x118] sm:$0x7] %v336_v39 }
  0xb2   :  { %v361_v40 = vpop.permute.xlu1 %360  ;;  %v136_v41 = vpop.permute.xlu0 %135 }
  0xb3   :  { %v141_v42 = vsel %vm137_vm3, %v134_v36, %v136_v41  ;;  %151 = vst.msk [vmem:[#allocation2 + $0x48] sm:$0x7] %vm117_vm1, %v136_v41  ;;  %v420_v44 = vld [vmem:[#allocation2 + $0x120] sm:$0xff]  ;;  %v414_v51 = vld [vmem:[#allocation2 + $0xf0] sm:$0xff] }
  0xb4   :  { %150 = vst [vmem:[#allocation2 + $0x40] sm:$0x7] %v141_v42  ;;  %v2011_v45 = vpack.c.bf16 %v420_v44, %v415_v43 }
  0xb6   :  { %v359_v46 = vpop.permute.xlu1 %358  ;;  %v2573_v47 = vpop.permute.xlu0 %362  ;;  %2012 = vmatprep.subr.bf16.mxu0 %v2011_v45 }
  0xb7   :  { %v369_v48 = vsel %vm368_vm9, %v359_v46, %v361_v40  ;;  %v370_v49 = vsel %vm368_vm9, %v361_v40, %v2573_v47  ;;  %v419_v52 = vld [vmem:[#allocation2 + $0x118] sm:$0xff] }
  0xb8   :  { %378 = vst [vmem:[#allocation2 + $0x140] sm:$0x7] %v369_v48  ;;  %379 = vst [vmem:[#allocation2 + $0x148] sm:$0x7] %v370_v49  ;;  %v2013_v53 = vpack.c.bf16 %v419_v52, %v414_v51  ;;  %v391_v59 = vld [vmem:[#allocation2 + $0x38] sm:$0xff] }
  0xb9   :  { %v2017_v1 = vpack.c.bf16 %v391_v59, %v386_v57 }
  0xba   :  { %v169_v55 = vpop.permute.xlu1 %168  ;;  %v167_v56 = vpop.permute.xlu0 %166  ;;  %2014 = vmatpush1.bf16.msra.mxu0 %v2013_v53  ;;  %v393_v5 = vld [vmem:[#allocation2 + $0x48] sm:$0xff] }
  0xbb   :  { %184 = vst.msk [vmem:[#allocation2 + $0x70] sm:$0x7] %vm117_vm1, %v169_v55  ;;  %v173_v60 = vsel %vm170_vm2, %v2536_v50, %v167_v56  ;;  %v174_v61 = vsel %vm170_vm2, %v167_v56, %v169_v55  ;;  %v392_v62 = vld [vmem:[#allocation2 + $0x40] sm:$0xff]  ;;  %v2032_v11 = vpack.c.bf16 %v393_v5, %v388_v4 }
  0xbc   :  { %182 = vst [vmem:[#allocation2 + $0x60] sm:$0x7] %v173_v60  ;;  %183 = vst [vmem:[#allocation2 + $0x68] sm:$0x7] %v174_v61  ;;  %v2015_v63 = vpack.c.bf16 %v392_v62, %v387_v54 }
  0xbe   :  { %v202_v2 = vpop.permute.xlu1 %201  ;;  %v200_v3 = vpop.permute.xlu0 %199  ;;  %2016 = vmatprep.subr.bf16.mxu1 %v2015_v63 }
  0xbf   :  { %217 = vst.msk [vmem:[#allocation2 + $0x98] sm:$0x7] %vm117_vm1, %v202_v2  ;;  %v206_v6 = vsel %vm203_vm4, %v2543_v58, %v200_v3  ;;  %v207_v7 = vsel %vm203_vm4, %v200_v3, %v202_v2  ;;  %2018 = vmatpush1.bf16.msra.mxu1 %v2017_v1  ;;  %v425_v50 = vld [vmem:[#allocation2 + $0x148] sm:$0xff]  ;;  %v424_v9 = vld [vmem:[#allocation2 + $0x140] sm:$0xff] }
  0xc0   :  { %215 = vst [vmem:[#allocation2 + $0x88] sm:$0x7] %v206_v6  ;;  %216 = vst [vmem:[#allocation2 + $0x90] sm:$0x7] %v207_v7  ;;  %455 = vmatprep.subr.mxu0 %v425_v50 }
  0xc1   :  { %456 = vmatpush1.msra.mxu0 %v424_v9 }
  0xc2   :  { %v235_v12 = vpop.permute.xlu1 %234  ;;  %v233_v13 = vpop.permute.xlu0 %232  ;;  %2031 = vmatprep.subr.bf16.mxu0 %v2251_v15  ;;  %1854 = vmatmul.mubr.msk.f32.vlgmr.msra.gmra.mrb[0].mxu0 %vm435_vm10, %v2589_v10  ;;  %v398_v19 = vld [vmem:[#allocation2 + $0x70] sm:$0xff] }
  0xc3   :  { %250 = vst.msk [vmem:[#allocation2 + $0xc0] sm:$0x7] %vm117_vm1, %v235_v12  ;;  %v239_v58 = vsel %vm236_vm5, %v2549_v8, %v233_v13  ;;  %v240_v16 = vsel %vm236_vm5, %v233_v13, %v235_v12  ;;  %2033 = vmatpush3.bf16.msra.mxu0 %v2032_v11  ;;  %1975 = vmatprep.mubr.msk.f32.mxu0 %vm2252_vm11, %v2241_v0  ;;  %v397_v21 = vld [vmem:[#allocation2 + $0x68] sm:$0xff]  ;;  %v396_v26 = vld [vmem:[#allocation2 + $0x60] sm:$0xff] }
  0xc4   :  { %248 = vst [vmem:[#allocation2 + $0xb0] sm:$0x7] %v239_v58  ;;  %249 = vst [vmem:[#allocation2 + $0xb8] sm:$0x7] %v240_v16  ;;  %2034 = vmatprep.subr.bf16.mxu0 %v2251_v15 }
  0xc6   :  { %v268_v17 = vpop.permute.xlu1 %267  ;;  %v266_v18 = vpop.permute.xlu0 %265  ;;  %v403_v20 = vld [vmem:[#allocation2 + $0x98] sm:$0xff] }
  0xc7   :  { %283 = vst.msk [vmem:[#allocation2 + $0xe8] sm:$0x7] %vm117_vm1, %v268_v17  ;;  %v272_v8 = vsel %vm269_vm6, %v2553_v14, %v266_v18  ;;  %v273_v22 = vsel %vm269_vm6, %v266_v18, %v268_v17  ;;  %v2035_v23 = vpack.c.bf16 %v403_v20, %v398_v19  ;;  %v402_v25 = vld [vmem:[#allocation2 + $0x90] sm:$0xff]  ;;  %v401_v27 = vld [vmem:[#allocation2 + $0x88] sm:$0xff]  ;;  %v962_v19 = vld [vmem:[%s2899_s4] sm:$0xf] }
  0xc8   :  { %281 = vst [vmem:[#allocation2 + $0xd8] sm:$0x7] %v272_v8  ;;  %282 = vst [vmem:[#allocation2 + $0xe0] sm:$0x7] %v273_v22  ;;  %v2019_v28 = vpack.c.bf16 %v402_v25, %v397_v21  ;;  %v2021_v29 = vpack.c.bf16 %v401_v27, %v396_v26 }
  0xc9   :  { %2036 = vmatpush3.bf16.msra.mxu0 %v2035_v23 }
  0xca   :  { %v301_v31 = vpop.permute.xlu1 %300  ;;  %v299_v32 = vpop.permute.xlu0 %298  ;;  %2020 = vmatprep.subr.bf16.mxu1 %v2019_v28  ;;  %2037 = vmatprep.subr.bf16.mxu0 %v2251_v15  ;;  %v408_v36 = vld [vmem:[#allocation2 + $0xc0] sm:$0xff] }
  0xcb   :  { %316 = vst.msk [vmem:[#allocation2 + $0x110] sm:$0x7] %vm117_vm1, %v301_v31  ;;  %v305_v14 = vsel %vm302_vm7, %v2559_v24, %v299_v32  ;;  %v306_v33 = vsel %vm302_vm7, %v299_v32, %v301_v31  ;;  %2022 = vmatpush1.bf16.msra.mxu1 %v2021_v29  ;;  %v407_v38 = vld [vmem:[#allocation2 + $0xb8] sm:$0xff]  ;;  %v406_v24 = vld [vmem:[#allocation2 + $0xb0] sm:$0xff] }
  0xcc   :  { %314 = vst [vmem:[#allocation2 + $0x100] sm:$0x7] %v305_v14  ;;  %315 = vst [vmem:[#allocation2 + $0x108] sm:$0x7] %v306_v33 }
  0xce   :  { %v334_v34 = vpop.permute.xlu1 %333  ;;  %v332_v35 = vpop.permute.xlu0 %331  ;;  %v413_v37 = vld [vmem:[#allocation2 + $0xe8] sm:$0xff] }
  0xcf   :  { %349 = vst.msk [vmem:[#allocation2 + $0x138] sm:$0x7] %vm117_vm1, %v334_v34  ;;  %v338_v39 = vsel %vm335_vm8, %v2563_v30, %v332_v35  ;;  %v339_v40 = vsel %vm335_vm8, %v332_v35, %v334_v34  ;;  %v2038_v41 = vpack.c.bf16 %v413_v37, %v408_v36  ;;  %v412_v42 = vld [vmem:[#allocation2 + $0xe0] sm:$0xff]  ;;  %v411_v43 = vld [vmem:[#allocation2 + $0xd8] sm:$0xff] }
  0xd0   :  { %347 = vst [vmem:[#allocation2 + $0x128] sm:$0x7] %v338_v39  ;;  %348 = vst [vmem:[#allocation2 + $0x130] sm:$0x7] %v339_v40  ;;  %v2023_v44 = vpack.c.bf16 %v412_v42, %v407_v38  ;;  %v2025_v45 = vpack.c.bf16 %v411_v43, %v406_v24 }
  0xd1   :  { %2039 = vmatpush3.bf16.msra.mxu0 %v2038_v41 }
  0xd2   :  { %v365_v46 = vpop.permute.xlu0 %364  ;;  %2024 = vmatprep.subr.bf16.mxu1 %v2023_v44  ;;  %v367_v48 = vpop.permute.xlu1 %366  ;;  %2040 = vmatprep.subr.bf16.mxu0 %v2251_v15  ;;  %v418_v51 = vld [vmem:[#allocation2 + $0x110] sm:$0xff] }
  0xd3   :  { %v371_v49 = vsel %vm368_vm9, %v2573_v47, %v365_v46  ;;  %2026 = vmatpush1.bf16.msra.mxu1 %v2025_v45  ;;  %v372_v30 = vsel %vm368_vm9, %v365_v46, %v367_v48  ;;  %382 = vst.msk [vmem:[#allocation2 + $0x160] sm:$0x7] %vm117_vm1, %v367_v48  ;;  %v417_v53 = vld [vmem:[#allocation2 + $0x108] sm:$0xff]  ;;  %v416_v56 = vld [vmem:[#allocation2 + $0x100] sm:$0xff]  ;;  %vm1450_vm1 = vcmask 519168  }
  0xd4   :  { %380 = vst [vmem:[#allocation2 + $0x150] sm:$0x7] %v371_v49  ;;  %381 = vst [vmem:[#allocation2 + $0x158] sm:$0x7] %v372_v30 }
  0xd6   :  { %v423_v52 = vld [vmem:[#allocation2 + $0x138] sm:$0xff] }
  0xd7   :  { %v2041_v54 = vpack.c.bf16 %v423_v52, %v418_v51  ;;  %v422_v55 = vld [vmem:[#allocation2 + $0x130] sm:$0xff]  ;;  %v421_v57 = vld [vmem:[#allocation2 + $0x128] sm:$0xff] }
  0xd8   :  { %v2027_v59 = vpack.c.bf16 %v422_v55, %v417_v53  ;;  %v2029_v60 = vpack.c.bf16 %v421_v57, %v416_v56 }
  0xd9   :  { %2042 = vmatpush3.bf16.msra.mxu0 %v2041_v54 }
  0xda   :  { %2028 = vmatprep.subr.bf16.mxu1 %v2027_v59  ;;  %1973 = vmatprep.subr.mxu0 %v2241_v0  ;;  %v428_v47 = vld [vmem:[#allocation2 + $0x160] sm:$0xff] }
  0xdb   :  { %2030 = vmatpush1.bf16.msra.mxu1 %v2029_v60  ;;  %v427_v61 = vld [vmem:[#allocation2 + $0x158] sm:$0xff]  ;;  %v426_v62 = vld [vmem:[#allocation2 + $0x150] sm:$0xff] }
  0xdc   :  { %526 = vmatprep.subr.mxu1 %v427_v61 }
  0xdd   :  { %1974 = vmatpush3.msra.mxu0 %v428_v47 }
  0xde   :  { %1976 = vmatmul.mubr.msk.f32.vlgmr.msra.gmra.mrb[2].mxu0 %vm435_vm10, %v2589_v10 }
  0xdf   :  { %527 = vmatpush1.msra.mxu1 %v426_v62  ;;  %1106 = vmatprep.mubr.f32.mxu0 %v2241_v0 }
  0xe0   :  { %1855 = vmatmul.mubr.msk.f32.vlgmr.msra.gmra.mrb[0].mxu1 %vm435_vm10, %v2589_v10 }
  0xe1   :  { %1035 = vmatprep.mubr.f32.mxu1 %v2241_v0 }
  0xe3   :  { %v433_v63 = vpop.permute.xlu0 %432 }
 0x195   :  { %v505_v1 = vpop.f32.mrb[0].mxu0 }
 0x196   :  { %v506_v2 = vadd.f32 %v505_v1, %v433_v63  ;;  %v507_v3 = vpop.f32.mrb[1].mxu0 }
 0x197   :  { %v508_v4 = vadd.f32 %v507_v3, %v433_v63 }
 0x198   :  { %v2626_v5 = vmax.f32 %v506_v2, 0.0 }
 0x199   :  { %v2628_v6 = vmax.f32 %v508_v4, 0.0 }
 0x19a   :  { %665 = vst [vmem:[#allocation2] sm:$0xff] %v2626_v5  ;;  %679 = vrot.lane.b32.xlu0 %v2626_v5, %s2242_s25 }
 0x19b   :  { %666 = vst [vmem:[#allocation2 + $0x8] sm:$0xff] %v2628_v6 }
 0x1b1   :  { %v647_v7 = vpop.f32.mrb[2].mxu0 }
 0x1b2   :  { %v648_v50 = vadd.f32 %v647_v7, %v433_v63  ;;  %v1977_v9 = vpop.f32.mrb[3].mxu0 }
 0x1b3   :  { %v576_v10 = vpop.f32.mrb[0].mxu1 }
 0x1b4   :  { %v577_v11 = vadd.f32 %v576_v10, %v433_v63  ;;  %v655_v12 = vmax.f32 %v648_v50, 0.0  ;;  %v578_v13 = vpop.f32.mrb[1].mxu1 }
 0x1b5   :  { %v579_v58 = vadd.f32 %v578_v13, %v433_v63 }
 0x1b6   :  { %v2634_v16 = vmax.f32 %v577_v11, 0.0  ;;  %660 = vst.msk [vmem:[#allocation3 + $0x20] sm:$0xff] %vm62_vm0, %v655_v12 }
 0x1b7   :  { %v2637_v17 = vmax.f32 %v579_v58, 0.0 }
 0x1b8   :  { %667 = vst [vmem:[#allocation2 + $0x10] sm:$0xff] %v2634_v16  ;;  %683 = vrot.lane.b32.xlu1 %v2634_v16, %s2242_s25  ;;  %715 = vrot.lane.b32.xlu0 %v2634_v16, %s2243_s15 }
 0x1b9   :  { %668 = vst [vmem:[#allocation2 + $0x18] sm:$0xff] %v2637_v17 }
 0x1bc   :  { %711 = vrot.lane.b32.xlu1 %v2626_v5, %s2243_s15  ;;  %747 = vrot.lane.b32.xlu0 %v2634_v16, %s2244_s16 }
 0x1bd   :  { %v705_v18 = vld [vmem:[#allocation3 + $0x20] sm:$0xff] }
 0x1c0   :  { %775 = vrot.lane.b32.xlu1 %v2626_v5, %s2245_s24  ;;  %743 = vrot.lane.b32.xlu0 %v2626_v5, %s2244_s16 }
 0x1c4   :  { %681 = vrot.lane.b32.xlu1 %v2628_v6, %s2242_s25  ;;  %779 = vrot.lane.b32.xlu0 %v2634_v16, %s2245_s24 }
 0x1c8   :  { %713 = vrot.lane.b32.xlu1 %v2628_v6, %s2243_s15  ;;  %811 = vrot.lane.b32.xlu0 %v2634_v16, %s2246_s28 }
 0x1cc   :  { %717 = vrot.lane.b32.xlu1 %v2637_v17, %s2243_s15  ;;  %807 = vrot.lane.b32.xlu0 %v2626_v5, %s2246_s28 }
 0x1d0   :  { %745 = vrot.lane.b32.xlu1 %v2628_v6, %s2244_s16  ;;  %843 = vrot.lane.b32.xlu0 %v2634_v16, %s2247_s5 }
 0x1d4   :  { %749 = vrot.lane.b32.xlu1 %v2637_v17, %s2244_s16  ;;  %875 = vrot.lane.b32.xlu0 %v2634_v16, %s2248_s29 }
 0x1d8   :  { %777 = vrot.lane.b32.xlu1 %v2628_v6, %s2245_s24  ;;  %685 = vrot.lane.b32.xlu0 %v2637_v17, %s2242_s25 }
 0x1dc   :  { %781 = vrot.lane.b32.xlu1 %v2637_v17, %s2245_s24  ;;  %871 = vrot.lane.b32.xlu0 %v2626_v5, %s2248_s29 }
 0x1e0   :  { %809 = vrot.lane.b32.xlu1 %v2628_v6, %s2246_s28  ;;  %719 = vrot.lane.b32.xlu0 %v705_v18, %s2243_s15 }
 0x1e4   :  { %813 = vrot.lane.b32.xlu1 %v2637_v17, %s2246_s28  ;;  %751 = vrot.lane.b32.xlu0 %v705_v18, %s2244_s16 }
 0x1e8   :  { %841 = vrot.lane.b32.xlu1 %v2628_v6, %s2247_s5  ;;  %783 = vrot.lane.b32.xlu0 %v705_v18, %s2245_s24 }
 0x1ec   :  { %845 = vrot.lane.b32.xlu1 %v2637_v17, %s2247_s5  ;;  %815 = vrot.lane.b32.xlu0 %v705_v18, %s2246_s28 }
 0x1f0   :  { %873 = vrot.lane.b32.xlu1 %v2628_v6, %s2248_s29  ;;  %847 = vrot.lane.b32.xlu0 %v705_v18, %s2247_s5 }
 0x1f4   :  { %687 = vrot.lane.b32.xlu1 %v705_v18, %s2242_s25  ;;  %879 = vrot.lane.b32.xlu0 %v705_v18, %s2248_s29 }
 0x1f8   :  { %877 = vrot.lane.b32.xlu1 %v2637_v17, %s2248_s29  ;;  %907 = vrot.lane.b32.xlu0 %v2634_v16, %s2249_s21  ;;  %s2254_s29 = smov 119  }
 0x1fc   :  { %839 = vrot.lane.b32.xlu1 %v2626_v5, %s2247_s5  ;;  %911 = vrot.lane.b32.xlu0 %v705_v18, %s2249_s21 }
 0x200   :  { %905 = vrot.lane.b32.xlu1 %v2628_v6, %s2249_s21  ;;  %965 = vperm.xlu0 %2194, %v962_v19  }
 0x204   :  { %909 = vrot.lane.b32.xlu1 %v2637_v17, %s2249_s21 }
 0x208   :  { %903 = vrot.lane.b32.xlu1 %v2626_v5, %s2249_s21 }
 0x20c   :  { %v680_v20 = vpop.permute.xlu0 %679 }
 0x22a   :  { %v684_v21 = vpop.permute.xlu1 %683  ;;  %v716_v8 = vpop.permute.xlu0 %715 }
 0x22e   :  { %v712_v22 = vpop.permute.xlu1 %711  ;;  %v748_v23 = vpop.permute.xlu0 %747 }
 0x232   :  { %v776_v25 = vpop.permute.xlu1 %775  ;;  %v744_v26 = vpop.permute.xlu0 %743 }
 0x236   :  { %v682_v27 = vpop.permute.xlu1 %681  ;;  %v780_v28 = vpop.permute.xlu0 %779 }
 0x237   :  { %v689_v29 = vsel %vm137_vm3, %v680_v20, %v682_v27  ;;  %v690_v31 = vsel %vm137_vm3, %v682_v27, %v684_v21 }
 0x238   :  { %697 = vst [vmem:[#allocation2 + $0x28] sm:$0xff] %v689_v29  ;;  %698 = vst [vmem:[#allocation2 + $0x30] sm:$0xff] %v690_v31  ;;  %v2043_v32 = vpack.c.bf16 %v690_v31, %v2628_v6  ;;  %v2045_v14 = vpack.c.bf16 %v689_v29, %v2626_v5 }
 0x23a   :  { %v714_v33 = vpop.permute.xlu1 %713  ;;  %v812_v34 = vpop.permute.xlu0 %811  ;;  %2044 = vmatprep.subr.bf16.mxu1 %v2043_v32 }
 0x23b   :  { %v721_v35 = vsel %vm170_vm2, %v712_v22, %v714_v33  ;;  %v722_v36 = vsel %vm170_vm2, %v714_v33, %v716_v8  ;;  %2046 = vmatpush1.bf16.msra.mxu1 %v2045_v14 }
 0x23c   :  { %729 = vst [vmem:[#allocation2 + $0x50] sm:$0xff] %v721_v35  ;;  %730 = vst [vmem:[#allocation2 + $0x58] sm:$0xff] %v722_v36 }
 0x23e   :  { %v718_v37 = vpop.permute.xlu1 %717  ;;  %v808_v38 = vpop.permute.xlu0 %807 }
 0x23f   :  { %v2721_v39 = vsel %vm170_vm2, %v716_v8, %v718_v37 }
 0x240   :  { %731 = vst [vmem:[#allocation2 + $0x60] sm:$0xff] %v2721_v39 }
 0x242   :  { %v746_v40 = vpop.permute.xlu1 %745  ;;  %v844_v41 = vpop.permute.xlu0 %843 }
 0x243   :  { %v753_v42 = vsel %vm203_vm4, %v744_v26, %v746_v40  ;;  %v754_v24 = vsel %vm203_vm4, %v746_v40, %v748_v23  ;;  %v1165_v40 = vld [vmem:[#allocation6 + $0x180] sm:$0xff] }
 0x244   :  { %761 = vst [vmem:[#allocation2 + $0x78] sm:$0xff] %v753_v42  ;;  %762 = vst [vmem:[#allocation2 + $0x80] sm:$0xff] %v754_v24  ;;  %v2047_v43 = vpack.c.bf16 %v754_v24, %v722_v36  ;;  %v2049_v44 = vpack.c.bf16 %v753_v42, %v721_v35  ;;  %v1166_v24 = vld [vmem:[#allocation6 + $0x188] sm:$0xff] }
 0x246   :  { %v750_v45 = vpop.permute.xlu1 %749  ;;  %v2726_v46 = vpop.permute.xlu0 %875  ;;  %2048 = vmatprep.subr.bf16.mxu1 %v2047_v43  ;;  %v1133_v43 = vld [vmem:[#allocation6 + $0x80] sm:$0xff] }
 0x247   :  { %v2729_v48 = vsel %vm203_vm4, %v748_v23, %v750_v45  ;;  %2050 = vmatpush1.bf16.msra.mxu1 %v2049_v44  ;;  %v1134_v44 = vld [vmem:[#allocation6 + $0x88] sm:$0xff] }
 0x248   :  { %763 = vst [vmem:[#allocation2 + $0x88] sm:$0xff] %v2729_v48  ;;  %v2065_v32 = vpack.c.bf16 %v2729_v48, %v2721_v39  ;;  %v1149_v48 = vld [vmem:[#allocation6 + $0x100] sm:$0xff] }
 0x24a   :  { %v778_v49 = vpop.permute.xlu1 %777  ;;  %v686_v30 = vpop.permute.xlu0 %685 }
 0x24b   :  { %v785_v51 = vsel %vm236_vm5, %v776_v25, %v778_v49  ;;  %v786_v52 = vsel %vm236_vm5, %v778_v49, %v780_v28  ;;  %v691_v53 = vsel %vm137_vm3, %v684_v21, %v686_v30  ;;  %v1150_v49 = vld [vmem:[#allocation6 + $0x108] sm:$0xff] }
 0x24c   :  { %793 = vst [vmem:[#allocation2 + $0xa0] sm:$0xff] %v785_v51  ;;  %794 = vst [vmem:[#allocation2 + $0xa8] sm:$0xff] %v786_v52  ;;  %v2061_v25 = vpack.c.bf16 %v691_v53, %v2634_v16 }
 0x24d   :  { %699 = vst [vmem:[#allocation2 + $0x38] sm:$0xff] %v691_v53  ;;  %v1168_v53 = vld [vmem:[#allocation6 + $0x198] sm:$0xff] }
 0x24e   :  { %v782_v54 = vpop.permute.xlu1 %781  ;;  %v872_v55 = vpop.permute.xlu0 %871 }
 0x24f   :  { %v2736_v56 = vsel %vm236_vm5, %v780_v28, %v782_v54 }
 0x250   :  { %795 = vst [vmem:[#allocation2 + $0xb0] sm:$0xff] %v2736_v56 }
 0x252   :  { %v810_v57 = vpop.permute.xlu1 %809  ;;  %v720_v59 = vpop.permute.xlu0 %719 }
 0x253   :  { %v817_v60 = vsel %vm269_vm6, %v808_v38, %v810_v57  ;;  %v818_v47 = vsel %vm269_vm6, %v810_v57, %v812_v34  ;;  %v724_v61 = vsel %vm170_vm2, %v718_v37, %v720_v59  ;;  %v1136_v57 = vld [vmem:[#allocation6 + $0x98] sm:$0xff] }
 0x254   :  { %825 = vst [vmem:[#allocation2 + $0xc8] sm:$0xff] %v817_v60  ;;  %826 = vst [vmem:[#allocation2 + $0xd0] sm:$0xff] %v818_v47  ;;  %v2051_v62 = vpack.c.bf16 %v818_v47, %v786_v52  ;;  %v2053_v63 = vpack.c.bf16 %v817_v60, %v785_v51  ;;  %v1118_v51 = vld [vmem:[#allocation6 + $0x8] sm:$0xff]  ;;  %v1167_v52 = vld [vmem:[#allocation6 + $0x190] sm:$0xff]  ;;  %v2075_v60 = vpack.c.bf16 %v1134_v44, %v1133_v43 }
 0x255   :  { %732 = vst [vmem:[#allocation2 + $0x68] sm:$0xff] %v724_v61  ;;  %v2109_v47 = vpack.c.bf16 %v1150_v49, %v1149_v48  ;;  %v1176_v43 = vld [vmem:[#allocation6 + $0x1d8] sm:$0xff]  ;;  %v1143_v44 = vld [vmem:[#allocation6 + $0xd0] sm:$0xff] }
 0x256   :  { %v814_v1 = vpop.permute.xlu1 %813  ;;  %v752_v2 = vpop.permute.xlu0 %751  ;;  %2052 = vmatprep.subr.bf16.mxu1 %v2051_v62 }
 0x257   :  { %v819_v3 = vsel %vm269_vm6, %v812_v34, %v814_v1  ;;  %v756_v4 = vsel %vm203_vm4, %v750_v45, %v752_v2  ;;  %2054 = vmatpush1.bf16.msra.mxu1 %v2053_v63  ;;  %v2111_v63 = vpack.c.bf16 %v1168_v53, %v1167_v52  ;;  %v1152_v2 = vld [vmem:[#allocation6 + $0x118] sm:$0xff]  ;;  %v1127_v52 = vld [vmem:[#allocation6 + $0x50] sm:$0xff] }
 0x258   :  { %827 = vst [vmem:[#allocation2 + $0xd8] sm:$0xff] %v819_v3  ;;  %764 = vst [vmem:[#allocation2 + $0x90] sm:$0xff] %v756_v4  ;;  %v2063_v28 = vpack.c.bf16 %v756_v4, %v724_v61  ;;  %v2069_v35 = vpack.c.bf16 %v819_v3, %v2736_v56  ;;  %v1135_v56 = vld [vmem:[#allocation6 + $0x90] sm:$0xff] }
 0x259   :  { %v1119_v3 = vld [vmem:[#allocation6 + $0x10] sm:$0xff]  ;;  %v2079_v4 = vpack.c.bf16 %v1136_v57, %v1135_v56  ;;  %v1178_v56 = vld [vmem:[#allocation6 + $0x1e8] sm:$0xff] }
 0x25a   :  { %v842_v5 = vpop.permute.xlu1 %841  ;;  %v784_v6 = vpop.permute.xlu0 %783 }
 0x25b   :  { %v850_v7 = vsel %vm302_vm7, %v842_v5, %v844_v41  ;;  %v788_v50 = vsel %vm236_vm5, %v782_v54, %v784_v6  ;;  %v925_v54 = vld [vmem:[%s2898_s3] sm:$0xf]  ;;  %s2255_s3 = smov 118  }
 0x25c   :  { %858 = vst [vmem:[#allocation2 + $0xf8] sm:$0xff] %v850_v7  ;;  %796 = vst [vmem:[#allocation2 + $0xb8] sm:$0xff] %v788_v50  ;;  %v1169_v6 = vld [vmem:[#allocation6 + $0x1a0] sm:$0xff] }
 0x25e   :  { %v846_v9 = vpop.permute.xlu1 %845  ;;  %v816_v10 = vpop.permute.xlu0 %815 }
 0x25f   :  { %v851_v11 = vsel %vm302_vm7, %v844_v41, %v846_v9  ;;  %v820_v12 = vsel %vm269_vm6, %v814_v1, %v816_v10  ;;  %v1151_v1 = vld [vmem:[#allocation6 + $0x110] sm:$0xff] }
 0x260   :  { %859 = vst [vmem:[#allocation2 + $0x100] sm:$0xff] %v851_v11  ;;  %828 = vst [vmem:[#allocation2 + $0xe0] sm:$0xff] %v820_v12  ;;  %v2113_v10 = vpack.c.bf16 %v1152_v2, %v1151_v1  ;;  %v1162_v1 = vld [vmem:[#allocation6 + $0x168] sm:$0xff]  ;;  %v1129_v2 = vld [vmem:[#allocation6 + $0x60] sm:$0xff] }
 0x262   :  { %v874_v13 = vpop.permute.xlu1 %873  ;;  %v848_v58 = vpop.permute.xlu0 %847 }
 0x263   :  { %v881_v18 = vsel %vm335_vm8, %v872_v55, %v874_v13  ;;  %v882_v19 = vsel %vm335_vm8, %v874_v13, %v2726_v46  ;;  %v852_v20 = vsel %vm302_vm7, %v846_v9, %v848_v58  ;;  %v2107_v55 = vpack.c.bf16 %v1166_v24, %v1165_v40  ;;  %v1138_v9 = vld [vmem:[#allocation6 + $0xa8] sm:$0xff]  ;;  %v1153_v13 = vld [vmem:[#allocation6 + $0x120] sm:$0xff]  ;;  %v1175_v24 = vld [vmem:[#allocation6 + $0x1d0] sm:$0xff] }
 0x264   :  { %889 = vst [vmem:[#allocation2 + $0x118] sm:$0xff] %v881_v18  ;;  %890 = vst [vmem:[#allocation2 + $0x120] sm:$0xff] %v882_v19  ;;  %v2055_v21 = vpack.c.bf16 %v882_v19, %v850_v7  ;;  %v1170_v7 = vld [vmem:[#allocation6 + $0x1a8] sm:$0xff]  ;;  %v1125_v40 = vld [vmem:[#allocation6 + $0x40] sm:$0xff]  ;;  %v2127_v49 = vpack.c.bf16 %v1176_v43, %v1175_v24 }
 0x265   :  { %860 = vst [vmem:[#allocation2 + $0x108] sm:$0xff] %v852_v20  ;;  %v1154_v58 = vld [vmem:[#allocation6 + $0x128] sm:$0xff]  ;;  %v1357_v43 = vld [vmem:[%s2902_s7] sm:$0xff] }
 0x266   :  { %v688_v8 = vpop.permute.xlu1 %687  ;;  %2056 = vmatprep.subr.bf16.mxu1 %v2055_v21  ;;  %v880_v26 = vpop.permute.xlu0 %879  ;;  %v1171_v21 = vld [vmem:[#allocation6 + $0x1b0] sm:$0xff] }
 0x267   :  { %v692_v22 = vsel %vm137_vm3, %v686_v30, %v688_v8  ;;  %v1117_v30 = vld [vmem:[#allocation6] sm:$0xff]  ;;  %v1172_v8 = vld [vmem:[#allocation6 + $0x1b8] sm:$0xff] }
 0x268   :  { %700 = vst [vmem:[#allocation2 + $0x40] sm:$0xff] %v692_v22  ;;  %v2059_v23 = vpack.c.bf16 %v692_v22, %v2637_v17  ;;  %v2067_v17 = vpack.c.bf16 %v820_v12, %v788_v50  ;;  %v2077_v62 = vpack.c.bf16 %v1118_v51, %v1117_v30  ;;  %v1137_v50 = vld [vmem:[#allocation6 + $0xa0] sm:$0xff]  ;;  %v2115_v12 = vpack.c.bf16 %v1170_v7, %v1169_v6  ;;  %v1139_v22 = vld [vmem:[#allocation6 + $0xb0] sm:$0xff]  ;;  %v1160_v51 = vld [vmem:[#allocation6 + $0x158] sm:$0xff] }
 0x269   :  { %v2083_v19 = vpack.c.bf16 %v1138_v9, %v1137_v50  ;;  %v1159_v30 = vld [vmem:[#allocation6 + $0x150] sm:$0xff]  ;;  %v1180_v7 = vld [vmem:[#allocation6 + $0x1f8] sm:$0xff] }
 0x26a   :  { %v878_v27 = vpop.permute.xlu1 %877  ;;  %2060 = vmatprep.subr.bf16.mxu0 %v2059_v23  ;;  %v908_v33 = vpop.permute.xlu0 %907  ;;  %v1140_v23 = vld [vmem:[#allocation6 + $0xb8] sm:$0xff]  ;;  %v2129_v57 = vpack.c.bf16 %v1160_v51, %v1159_v30  ;;  %v1179_v6 = vld [vmem:[#allocation6 + $0x1f0] sm:$0xff]  ;;  %v1361_v51 = vld [vmem:[%s2902_s7 + $0x20] sm:$0xff] }
 0x26b   :  { %v883_v29 = vsel %vm335_vm8, %v2726_v46, %v878_v27  ;;  %v884_v31 = vsel %vm335_vm8, %v878_v27, %v880_v26  ;;  %2062 = vmatpush1.bf16.msra.mxu0 %v2061_v25  ;;  %v2117_v25 = vpack.c.bf16 %v1154_v58, %v1153_v13  ;;  %v2119_v27 = vpack.c.bf16 %v1172_v8, %v1171_v21  ;;  %v1147_v9 = vld [vmem:[#allocation6 + $0xf0] sm:$0xff]  ;;  %v1164_v13 = vld [vmem:[#allocation6 + $0x178] sm:$0xff] }
 0x26c   :  { %891 = vst [vmem:[#allocation2 + $0x128] sm:$0xff] %v883_v29  ;;  %892 = vst [vmem:[#allocation2 + $0x130] sm:$0xff] %v884_v31  ;;  %2064 = vmatprep.subr.bf16.mxu0 %v2063_v28  ;;  %v2071_v37 = vpack.c.bf16 %v884_v31, %v852_v20  ;;  %v2073_v39 = vpack.c.bf16 %v883_v29, %v851_v11  ;;  %v1122_v20 = vld [vmem:[#allocation6 + $0x28] sm:$0xff]  ;;  %v1155_v28 = vld [vmem:[#allocation6 + $0x130] sm:$0xff]  ;;  %v2135_v50 = vpack.c.bf16 %v1180_v7, %v1179_v6  ;;  %vm1496_vm8 = vcmask 973824  }
 0x26d   :  { %v1156_v29 = vld [vmem:[#allocation6 + $0x138] sm:$0xff]  ;;  %v1123_v31 = vld [vmem:[#allocation6 + $0x30] sm:$0xff] }
 0x26e   :  { %v840_v14 = vpop.permute.xlu1 %839  ;;  %v912_v41 = vpop.permute.xlu0 %911  ;;  %v1131_v58 = vld [vmem:[#allocation6 + $0x70] sm:$0xff] }
 0x26f   :  { %v849_v16 = vsel %vm302_vm7, %v840_v14, %v842_v5  ;;  %2066 = vmatpush1.bf16.msra.mxu0 %v2065_v32  ;;  %v1120_v5 = vld [vmem:[#allocation6 + $0x18] sm:$0xff]  ;;  %v2087_v32 = vpack.c.bf16 %v1140_v23, %v1139_v22  ;;  %vm1483_vm7 = vcmask 982016  }
 0x270   :  { %857 = vst [vmem:[#allocation2 + $0xf0] sm:$0xff] %v849_v16  ;;  %2068 = vmatprep.subr.bf16.mxu0 %v2067_v17  ;;  %v2057_v34 = vpack.c.bf16 %v881_v18, %v849_v16  ;;  %v2081_v11 = vpack.c.bf16 %v1120_v5, %v1119_v3  ;;  %v1121_v18 = vld [vmem:[#allocation6 + $0x20] sm:$0xff]  ;;  %v1124_v14 = vld [vmem:[#allocation6 + $0x38] sm:$0xff]  ;;  %v1174_v16 = vld [vmem:[#allocation6 + $0x1c8] sm:$0xff] }
 0x271   :  { %v2085_v26 = vpack.c.bf16 %v1122_v20, %v1121_v18  ;;  %v1173_v17 = vld [vmem:[#allocation6 + $0x1c0] sm:$0xff]  ;;  %v1130_v3 = vld [vmem:[#allocation6 + $0x68] sm:$0xff]  ;;  %v1132_v18 = vld [vmem:[#allocation6 + $0x78] sm:$0xff] }
 0x272   :  { %v906_v36 = vpop.permute.xlu1 %905  ;;  %2058 = vmatpush1.bf16.msra.mxu1 %v2057_v34  ;;  %v1142_v34 = vld [vmem:[#allocation6 + $0xc8] sm:$0xff]  ;;  %v2101_v5 = vpack.c.bf16 %v1130_v3, %v1129_v2  ;;  %v2105_v20 = vpack.c.bf16 %v1132_v18, %v1131_v58  ;;  %v1351_v18 = vld [vmem:[%s2901_s6] sm:$0xf]  ;;  %s2253_s6 = smov 120  }
 0x273   :  { %v914_v38 = vsel %vm368_vm9, %v906_v36, %v908_v33  ;;  %2070 = vmatpush1.bf16.msra.mxu0 %v2069_v35  ;;  %v2121_v35 = vpack.c.bf16 %v1156_v29, %v1155_v28 }
 0x274   :  { %922 = vst [vmem:[#allocation2 + $0x148] sm:$0xff] %v914_v38  ;;  %987 = vmatprep.subr.mxu1 %v914_v38  ;;  %2072 = vmatprep.subr.bf16.mxu0 %v2071_v37  ;;  %v2123_v37 = vpack.c.bf16 %v1174_v16, %v1173_v17  ;;  %v1157_v38 = vld [vmem:[#allocation6 + $0x140] sm:$0xff] }
 0x276   :  { %v910_v42 = vpop.permute.xlu1 %909 }
 0x277   :  { %v915_v45 = vsel %vm368_vm9, %v908_v33, %v910_v42  ;;  %v916_v46 = vsel %vm368_vm9, %v910_v42, %v912_v41  ;;  %2074 = vmatpush1.bf16.msra.mxu0 %v2073_v39  ;;  %v1141_v33 = vld [vmem:[#allocation6 + $0xc0] sm:$0xff]  ;;  %v1158_v39 = vld [vmem:[#allocation6 + $0x148] sm:$0xff] }
 0x278   :  { %923 = vst [vmem:[#allocation2 + $0x150] sm:$0xff] %v915_v45  ;;  %924 = vst [vmem:[#allocation2 + $0x158] sm:$0xff] %v916_v46  ;;  %1058 = vmatprep.subr.mxu0 %v916_v46  ;;  %v2091_v41 = vpack.c.bf16 %v1142_v34, %v1141_v33  ;;  %v1126_v42 = vld [vmem:[#allocation6 + $0x48] sm:$0xff]  ;;  %v2125_v46 = vpack.c.bf16 %v1158_v39, %v1157_v38 }
 0x279   :  { %v2093_v48 = vpack.c.bf16 %v1126_v42, %v1125_v40  ;;  %v1358_v40 = vld [vmem:[%s2902_s7 + $0x8] sm:$0xff] }
 0x27a   :  { %v904_v59 = vpop.permute.xlu1 %903 }
 0x27b   :  { %v913_v61 = vsel %vm368_vm9, %v904_v59, %v906_v36  ;;  %1059 = vmatpush1.msra.mxu0 %v915_v45  ;;  %v2089_v36 = vpack.c.bf16 %v1124_v14, %v1123_v31  ;;  %v1144_v45 = vld [vmem:[#allocation6 + $0xd8] sm:$0xff]  ;;  %vm1509_vm9 = vcmask 965632  }
 0x27c   :  { %921 = vst [vmem:[#allocation2 + $0x140] sm:$0xff] %v913_v61  ;;  %988 = vmatpush1.msra.mxu1 %v913_v61  ;;  %1858 = vmatmul.mubr.msk.f32.vlgmr.msra.gmra.mrb[4].mxu0 %vm435_vm10, %v925_v54  ;;  %v2095_v53 = vpack.c.bf16 %v1144_v45, %v1143_v44  ;;  %v1146_v61 = vld [vmem:[#allocation6 + $0xe8] sm:$0xff]  ;;  %v1359_v44 = vld [vmem:[%s2902_s7 + $0x10] sm:$0xff] }
 0x27d   :  { %1857 = vmatmul.mubr.msk.f32.vlgmr.msra.gmra.mrb[2].mxu1 %vm435_vm10, %v925_v54  ;;  %2108 = vmatprep.subr.bf16.mxu0 %v2107_v55  ;;  %v1128_v54 = vld [vmem:[#allocation6 + $0x58] sm:$0xff]  ;;  %v1177_v55 = vld [vmem:[#allocation6 + $0x1e0] sm:$0xff]  ;;  %v2141_v45 = vpack.c.bf16 %v1359_v44, %v1357_v43 }
 0x27e   :  { %2076 = vmatprep.subr.bf16.mxu1 %v2075_v60  ;;  %2110 = vmatpush3.bf16.msra.mxu0 %v2109_v47  ;;  %v2097_v59 = vpack.c.bf16 %v1128_v54, %v1127_v52  ;;  %v2131_v60 = vpack.c.bf16 %v1178_v56, %v1177_v55  ;;  %v1145_v47 = vld [vmem:[#allocation6 + $0xe0] sm:$0xff]  ;;  %v1363_v52 = vld [vmem:[%s2902_s7 + $0x30] sm:$0xff] }
 0x27f   :  { %2078 = vmatpush3.bf16.msra.mxu1 %v2077_v62  ;;  %2112 = vmatprep.subr.bf16.mxu0 %v2111_v63  ;;  %v1161_v62 = vld [vmem:[#allocation6 + $0x160] sm:$0xff]  ;;  %v2099_v63 = vpack.c.bf16 %v1146_v61, %v1145_v47  ;;  %v966_v21 = vpop.permute.xlu0 %965  ;;  %v2145_v54 = vpack.c.bf16 %v1363_v52, %v1361_v51 }
 0x280   :  { %2080 = vmatprep.subr.bf16.mxu1 %v2079_v4  ;;  %v2133_v4 = vpack.c.bf16 %v1162_v1, %v1161_v62 }
 0x282   :  { %2114 = vmatpush3.bf16.msra.mxu0 %v2113_v10  ;;  %v1148_v10 = vld [vmem:[#allocation6 + $0xf8] sm:$0xff] }
 0x283   :  { %2082 = vmatpush3.bf16.msra.mxu1 %v2081_v11  ;;  %2116 = vmatprep.subr.bf16.mxu0 %v2115_v12  ;;  %v1163_v11 = vld [vmem:[#allocation6 + $0x170] sm:$0xff]  ;;  %v2103_v12 = vpack.c.bf16 %v1148_v10, %v1147_v9 }
 0x284   :  { %2084 = vmatprep.subr.bf16.mxu1 %v2083_v19  ;;  %v2137_v19 = vpack.c.bf16 %v1164_v13, %v1163_v11 }
 0x286   :  { %2118 = vmatpush3.bf16.msra.mxu0 %v2117_v25 }
 0x287   :  { %2086 = vmatpush3.bf16.msra.mxu1 %v2085_v26  ;;  %2120 = vmatprep.subr.bf16.mxu0 %v2119_v27 }
 0x288   :  { %2088 = vmatprep.subr.bf16.mxu1 %v2087_v32 }
 0x28a   :  { %2122 = vmatpush3.bf16.msra.mxu0 %v2121_v35 }
 0x28b   :  { %2090 = vmatpush3.bf16.msra.mxu1 %v2089_v36  ;;  %2124 = vmatprep.subr.bf16.mxu0 %v2123_v37 }
 0x28c   :  { %2092 = vmatprep.subr.bf16.mxu1 %v2091_v41  ;;  %v1360_v41 = vld [vmem:[%s2902_s7 + $0x18] sm:$0xff] }
 0x28d   :  { %v2139_v24 = vpack.c.bf16 %v1360_v41, %v1358_v40 }
 0x28e   :  { %2126 = vmatpush3.bf16.msra.mxu0 %v2125_v46 }
 0x28f   :  { %2094 = vmatpush3.bf16.msra.mxu1 %v2093_v48  ;;  %2128 = vmatprep.subr.bf16.mxu0 %v2127_v49  ;;  %v1362_v48 = vld [vmem:[%s2902_s7 + $0x28] sm:$0xff]  ;;  %v1364_v49 = vld [vmem:[%s2902_s7 + $0x38] sm:$0xff] }
 0x290   :  { %2096 = vmatprep.subr.bf16.mxu1 %v2095_v53  ;;  %v2143_v53 = vpack.c.bf16 %v1364_v49, %v1362_v48 }
 0x292   :  { %2130 = vmatpush3.bf16.msra.mxu0 %v2129_v57 }
 0x293   :  { %2098 = vmatpush3.bf16.msra.mxu1 %v2097_v59  ;;  %2132 = vmatprep.subr.bf16.mxu0 %v2131_v60 }
 0x294   :  { %2100 = vmatprep.subr.bf16.mxu1 %v2099_v63  ;;  %v1352_v63 = vlaneseq }
 0x296   :  { %2134 = vmatpush3.bf16.msra.mxu0 %v2133_v4  ;;  %v2801_v7 = vshrl.u32 %v1352_v63, 7 }
 0x297   :  { %2102 = vmatpush3.bf16.msra.mxu1 %v2101_v5  ;;  %2136 = vmatprep.subr.bf16.mxu0 %v2135_v50 }
 0x298   :  { %2104 = vmatprep.subr.bf16.mxu1 %v2103_v12  ;;  %v1354_v12 = vsub.s32 0, %v2801_v7 }
 0x29a   :  { %2138 = vmatpush3.bf16.msra.mxu0 %v2137_v19 }
 0x29b   :  { %2106 = vmatpush3.bf16.msra.mxu1 %v2105_v20  ;;  %2163 = vmatprep.subr.bf16.mxu0 %v2251_v15 }
 0x29c   :  { %2140 = vmatprep.subr.bf16.mxu1 %v2139_v24 }
 0x34f   :  { %v1108_v8 = vpop.f32.mrb[4].mxu0 }
 0x350   :  { %v1109_v22 = vadd.f32 %v1108_v8, %v966_v21  ;;  %v1037_v23 = vpop.f32.mrb[2].mxu1  ;;  %v1110_v25 = vpop.f32.mrb[5].mxu0 }
 0x351   :  { %v1038_v26 = vadd.f32 %v1037_v23, %v966_v21  ;;  %v1111_v27 = vadd.f32 %v1110_v25, %v966_v21  ;;  %v1039_v28 = vpop.f32.mrb[3].mxu1  ;;  %v1570_v25 = vld [vmem:[%s2905_s10] sm:$0xff] }
 0x352   :  { %v1040_v29 = vadd.f32 %v1039_v28, %v966_v21  ;;  %v1115_v32 = vmax.f32 %v1109_v22, 0.0 }
 0x353   :  { %v1116_v31 = vmax.f32 %v1111_v27, 0.0  ;;  %v1113_v17 = vmax.f32 %v1038_v26, 0.0 }
 0x354   :  { %v1114_v14 = vmax.f32 %v1040_v29, 0.0 }
 0x355   :  { %1315 = vmatprep.mubr.f32.mxu0 %v1116_v31 }
 0x356   :  { %1245 = vmatprep.mubr.f32.mxu1 %v1114_v14  ;;  %1316 = vmatmul.mubr.f32.vlgmr.msra.gmra.mrb[6].mxu0 %v1115_v32 }
 0x357   :  { %1246 = vmatmul.mubr.f32.vlgmr.msra.gmra.mrb[4].mxu1 %v1113_v17  ;;  %1996 = vmatprep.mubr.msk.f32.mxu0 %vm2252_vm11, %v2241_v0 }
 0x358   :  { %1433 = vmatprep.mubr.f32.mxu1 %v2241_v0  ;;  %2142 = vmatpush1.bf16.msra.mxu1 %v2141_v45 }
 0x359   :  { %2144 = vmatprep.subr.bf16.mxu1 %v2143_v53 }
 0x35c   :  { %2146 = vmatpush1.bf16.msra.mxu1 %v2145_v54 }
 0x429   :  { %v1944_v16 = vpop.f32.mrb[6].mxu0 }
 0x42a   :  { %v1909_v33 = vpop.f32.mrb[4].mxu1  ;;  %v1945_v34 = vpop.f32.mrb[7].mxu0 }
 0x42b   :  { %v1946_v35 = vadd.f32 %v1945_v34, %v1944_v16  ;;  %v1910_v36 = vpop.f32.mrb[5].mxu1 }
 0x42c   :  { %v1911_v37 = vadd.f32 %v1910_v36, %v1909_v33 }
 0x42e   :  { %v1318_v38 = vadd.f32 %v1946_v35, %v1911_v37 }
 0x430   :  { %v1321_v39 = vmul.f32 2.0, %v1318_v38 }
 0x432   :  { %v2175_v42 = vround.rtne.f32 %v1321_v39 }
 0x434   :  { %v1323_v46 = vmul.f32 0.5, %v2175_v42 }
 0x436   :  { %v1326_v30 = vmul.f32 %v1323_v46, %v1323_v46  ;;  %v1859_v55 = vadd.f32 1.0, %v1323_v46  ;;  %v1324_v56 = vadd.f32 3.0, %v1323_v46  ;;  %v1860_v57 = vadd.f32 -1.0, %v1323_v46 }
 0x437   :  { %v1861_v60 = vadd.f32 -3.0, %v1323_v46 }
 0x438   :  { %1328 = vrot.lane.b32.xlu1 %v1326_v30, %s2247_s5  ;;  %v1333_v59 = vmul.f32 %v1859_v55, %v1859_v55  ;;  %v1325_v47 = vmul.f32 %v1324_v56, %v1324_v56  ;;  %v1339_v62 = vmul.f32 %v1860_v57, %v1860_v57 }
 0x439   :  { %v1345_v3 = vmul.f32 %v1861_v60, %v1861_v60 }
 0x4aa   :  { %v1329_v61 = vpop.permute.xlu1 %1328 }
 0x4ab   :  { %v1331_v1 = vadd.f32 %v1329_v61, %v1325_v47  ;;  %v1334_v2 = vadd.f32 %v1333_v59, %v1329_v61  ;;  %v1340_v4 = vadd.f32 %v1339_v62, %v1329_v61  ;;  %v1346_v50 = vadd.f32 %v1345_v3, %v1329_v61 }
 0x4ad   :  { %vm1335_vm12 = vcmp.gt.f32.partialorder %v1334_v2, %v1331_v1 }
 0x4ae   :  { %v1336_v5 = vsel %vm1335_vm12, 1.0, %v2241_v0  ;;  %v1337_v6 = vsel %vm1335_vm12, %v1334_v2, %v1331_v1 }
 0x4af   :  { %vm1341_vm13 = vcmp.gt.f32.partialorder %v1340_v4, %v1337_v6 }
 0x4b0   :  { %v1342_v9 = vsel %vm1341_vm13, 2.0, %v1336_v5  ;;  %v1343_v10 = vsel %vm1341_vm13, %v1340_v4, %v1337_v6 }
 0x4b1   :  { %vm1347_vm14 = vcmp.gt.f32.partialorder %v1346_v50, %v1343_v10 }
 0x4b2   :  { %v1348_v11 = vsel %vm1347_vm14, 3.0, %v1342_v9 }
 0x4b3   :  { %v1349_v13 = vmul.f32 2.0, %v1348_v11  ;;  %v1551_v11 = vld [vmem:[%s2904_s9] sm:$0xff] }
 0x4b5   :  { %v1862_v58 = vadd.f32 -3.0, %v1349_v13 }
 0x4b7   :  { %v1355_v19 = vrot.slane %v1862_v58, %v1354_v12  ;;  %v1652_v58 = vld [vmem:[%s2903_s8] sm:$0x3] }
 0x4b9   :  { %v1356_v20 = vmul.f32 %v1355_v19, %v1351_v18  ;;  %v1660_v18 = vsub.s32 1, %v2801_v7  ;;  %v1768_v7 = vld [vmem:[%s2907_s12] sm:$0x7] }
 0x4bb   :  { %1863 = vmatmul.mubr.msk.f32.vlgmr.msra.gmra.mrb[6].mxu1 %vm1365_vm15, %v1356_v20 }
 0x4bc   :  { %1643 = vmatprep.mubr.f32.mxu1 %v2241_v0 }
 0x58e   :  { %v1435_v21 = vpop.f32.mrb[6].mxu1 }
 0x58f   :  { %v1437_v8 = vpop.f32.mrb[7].mxu1 }
 0x590   :  { %v1442_v22 = vcombine.low %v1435_v21, %v1437_v8  ;;  %v1866_v23 = vcombine.low %v1437_v8, %v1437_v8  ;;  %v1657_v8 = vrot.slane %v1652_v58, %v1354_v12 }
 0x592   :  { %1449 = vst [vmem:[#allocation2] sm:$0xf] %v1442_v22  ;;  %1457 = vrot.lane.b32.xlu1 %v1866_v23, %s2242_s25  ;;  %1455 = vrot.lane.b32.xlu0 %v1442_v22, %s2242_s25  ;;  %1451 = vst.msk [vmem:[#allocation2 + $0x8] sm:$0xf] %vm1450_vm1, %v1866_v23 }
 0x596   :  { %1469 = vrot.lane.b32.xlu1 %v1866_v23, %s2243_s15  ;;  %1467 = vrot.lane.b32.xlu0 %v1442_v22, %s2243_s15 }
 0x599   :  { %v1553_v16 = vld [vmem:[#allocation2 + $0x8] sm:$0xff]  ;;  %v1552_v36 = vld [vmem:[#allocation2] sm:$0xff] }
 0x59a   :  { %1481 = vrot.lane.b32.xlu1 %v1866_v23, %s2253_s6  ;;  %1479 = vrot.lane.b32.xlu0 %v1442_v22, %s2253_s6 }
 0x59e   :  { %1494 = vrot.lane.b32.xlu1 %v1866_v23, %s2254_s29  ;;  %1492 = vrot.lane.b32.xlu0 %v1442_v22, %s2254_s29 }
 0x5a2   :  { %1507 = vrot.lane.b32.xlu1 %v1866_v23, %s2255_s3  ;;  %1505 = vrot.lane.b32.xlu0 %v1442_v22, %s2255_s3 }
 0x5a6   :  { %1520 = vrot.lane.b32.xlu1 %v1866_v23, %s2244_s16  ;;  %1518 = vrot.lane.b32.xlu0 %v1442_v22, %s2244_s16 }
 0x5aa   :  { %1532 = vrot.lane.b32.xlu1 %v1866_v23, %s2245_s24  ;;  %1530 = vrot.lane.b32.xlu0 %v1442_v22, %s2245_s24 }
 0x5ae   :  { %1544 = vrot.lane.b32.xlu1 %v1866_v23, %s2246_s28  ;;  %1542 = vrot.lane.b32.xlu0 %v1442_v22, %s2246_s28 }
 0x5b2   :  { %1573 = vperm.xlu0 %2194, %v1570_v25   ;;  %v1661_v25 = vrot.slane %v1652_v58, %v1660_v18 }
 0x604   :  { %v1458_v26 = vpop.permute.xlu1 %1457  ;;  %v1456_v27 = vpop.permute.xlu0 %1455 }
 0x605   :  { %1463 = vst.msk [vmem:[#allocation2 + $0x30] sm:$0xf] %vm1450_vm1, %v1458_v26  ;;  %v1459_v28 = vsel %vm137_vm3, %v1456_v27, %v1458_v26 }
 0x606   :  { %1462 = vst [vmem:[#allocation2 + $0x28] sm:$0xf] %v1459_v28 }
 0x608   :  { %v1470_v29 = vpop.permute.xlu1 %1469  ;;  %v1468_v31 = vpop.permute.xlu0 %1467 }
 0x609   :  { %1475 = vst.msk [vmem:[#allocation2 + $0x58] sm:$0xf] %vm1450_vm1, %v1470_v29  ;;  %v1471_v32 = vsel %vm170_vm2, %v1468_v31, %v1470_v29 }
 0x60a   :  { %1474 = vst [vmem:[#allocation2 + $0x50] sm:$0xf] %v1471_v32 }
 0x60c   :  { %v1482_v14 = vpop.permute.xlu1 %1481  ;;  %v1480_v17 = vpop.permute.xlu0 %1479  ;;  %v1555_v33 = vld [vmem:[#allocation2 + $0x30] sm:$0xff] }
 0x60d   :  { %1488 = vst.msk [vmem:[#allocation2 + $0x80] sm:$0xf] %vm1450_vm1, %v1482_v14  ;;  %v1484_v34 = vsel %vm1483_vm7, %v1480_v17, %v1482_v14  ;;  %v2147_v35 = vpack.c.bf16 %v1555_v33, %v1553_v16  ;;  %v1554_v37 = vld [vmem:[#allocation2 + $0x28] sm:$0xff] }
 0x60e   :  { %1487 = vst [vmem:[#allocation2 + $0x78] sm:$0xf] %v1484_v34  ;;  %v2149_v38 = vpack.c.bf16 %v1554_v37, %v1552_v36 }
 0x60f   :  { %2148 = vmatprep.subr.bf16.mxu1 %v2147_v35 }
 0x610   :  { %v1495_v39 = vpop.permute.xlu1 %1494  ;;  %v1493_v40 = vpop.permute.xlu0 %1492  ;;  %2150 = vmatpush1.bf16.msra.mxu1 %v2149_v38  ;;  %v1557_v43 = vld [vmem:[#allocation2 + $0x58] sm:$0xff] }
 0x611   :  { %1501 = vst.msk [vmem:[#allocation2 + $0xa8] sm:$0xf] %vm1450_vm1, %v1495_v39  ;;  %v1497_v41 = vsel %vm1496_vm8, %v1493_v40, %v1495_v39  ;;  %v1556_v48 = vld [vmem:[#allocation2 + $0x50] sm:$0xff] }
 0x612   :  { %1500 = vst [vmem:[#allocation2 + $0xa0] sm:$0xf] %v1497_v41 }
 0x614   :  { %v1508_v42 = vpop.permute.xlu1 %1507  ;;  %v1506_v24 = vpop.permute.xlu0 %1505  ;;  %v1559_v44 = vld [vmem:[#allocation2 + $0x80] sm:$0xff] }
 0x615   :  { %1514 = vst.msk [vmem:[#allocation2 + $0xd0] sm:$0xf] %vm1450_vm1, %v1508_v42  ;;  %v1510_v45 = vsel %vm1509_vm9, %v1506_v24, %v1508_v42  ;;  %v2151_v46 = vpack.c.bf16 %v1559_v44, %v1557_v43  ;;  %v1558_v49 = vld [vmem:[#allocation2 + $0x78] sm:$0xff] }
 0x616   :  { %1513 = vst [vmem:[#allocation2 + $0xc8] sm:$0xf] %v1510_v45  ;;  %v2153_v30 = vpack.c.bf16 %v1558_v49, %v1556_v48 }
 0x617   :  { %2152 = vmatprep.subr.bf16.mxu1 %v2151_v46 }
 0x618   :  { %v1521_v51 = vpop.permute.xlu1 %1520  ;;  %v1519_v52 = vpop.permute.xlu0 %1518  ;;  %2154 = vmatpush1.bf16.msra.mxu1 %v2153_v30  ;;  %v1561_v56 = vld [vmem:[#allocation2 + $0xa8] sm:$0xff] }
 0x619   :  { %1526 = vst.msk [vmem:[#allocation2 + $0xf8] sm:$0xf] %vm1450_vm1, %v1521_v51  ;;  %v1522_v53 = vsel %vm203_vm4, %v1519_v52, %v1521_v51  ;;  %v1560_v47 = vld [vmem:[#allocation2 + $0xa0] sm:$0xff] }
 0x61a   :  { %1525 = vst [vmem:[#allocation2 + $0xf0] sm:$0xf] %v1522_v53 }
 0x61c   :  { %v1533_v54 = vpop.permute.xlu1 %1532  ;;  %v1531_v55 = vpop.permute.xlu0 %1530  ;;  %v1563_v57 = vld [vmem:[#allocation2 + $0xd0] sm:$0xff] }
 0x61d   :  { %1538 = vst.msk [vmem:[#allocation2 + $0x120] sm:$0xf] %vm1450_vm1, %v1533_v54  ;;  %v1534_v59 = vsel %vm236_vm5, %v1531_v55, %v1533_v54  ;;  %v2155_v60 = vpack.c.bf16 %v1563_v57, %v1561_v56  ;;  %v1562_v61 = vld [vmem:[#allocation2 + $0xc8] sm:$0xff]  ;;  %v1758_v56 = vld [vmem:[%s2906_s11] sm:$0x7] }
 0x61e   :  { %1537 = vst [vmem:[#allocation2 + $0x118] sm:$0xf] %v1534_v59  ;;  %v2157_v62 = vpack.c.bf16 %v1562_v61, %v1560_v47 }
 0x61f   :  { %2156 = vmatprep.subr.bf16.mxu1 %v2155_v60 }
 0x620   :  { %v1545_v63 = vpop.permute.xlu1 %1544  ;;  %v1543_v1 = vpop.permute.xlu0 %1542  ;;  %2158 = vmatpush1.bf16.msra.mxu1 %v2157_v62  ;;  %v1565_v3 = vld [vmem:[#allocation2 + $0xf8] sm:$0xff] }
 0x621   :  { %1550 = vst.msk [vmem:[#allocation2 + $0x148] sm:$0xf] %vm1450_vm1, %v1545_v63  ;;  %v1546_v2 = vsel %vm269_vm6, %v1543_v1, %v1545_v63  ;;  %v1564_v6 = vld [vmem:[#allocation2 + $0xf0] sm:$0xff] }
 0x622   :  { %1549 = vst [vmem:[#allocation2 + $0x140] sm:$0xf] %v1546_v2 }
 0x624   :  { %v1567_v4 = vld [vmem:[#allocation2 + $0x120] sm:$0xff] }
 0x625   :  { %v2159_v5 = vpack.c.bf16 %v1567_v4, %v1565_v3  ;;  %v1566_v50 = vld [vmem:[#allocation2 + $0x118] sm:$0xff] }
 0x626   :  { %v2161_v9 = vpack.c.bf16 %v1566_v50, %v1564_v6 }
 0x627   :  { %2160 = vmatprep.subr.bf16.mxu1 %v2159_v5 }
 0x628   :  { %2162 = vmatpush1.bf16.msra.mxu1 %v2161_v9  ;;  %v1569_v10 = vld [vmem:[#allocation2 + $0x148] sm:$0xff] }
 0x629   :  { %1595 = vmatprep.subr.mxu1 %v1569_v10  ;;  %v1568_v13 = vld [vmem:[#allocation2 + $0x140] sm:$0xff] }
 0x62c   :  { %1596 = vmatpush1.msra.mxu1 %v1568_v13 }
 0x62d   :  { %1864 = vmatmul.mubr.msk.f32.vlgmr.msra.gmra.mrb[8].mxu1 %vm435_vm10, %v1551_v11 }
 0x631   :  { %v1574_v19 = vpop.permute.xlu0 %1573 }
 0x700   :  { %v1645_v20 = vpop.f32.mrb[8].mxu1 }
 0x701   :  { %v1646_v21 = vadd.f32 %v1645_v20, %v1574_v19  ;;  %v1647_v22 = vpop.f32.mrb[9].mxu1 }
 0x702   :  { %v1648_v23 = vadd.f32 %v1647_v22, %v1574_v19 }
 0x703   :  { %v1650_v26 = vmax.f32 %v1646_v21, 0.0 }
 0x704   :  { %v1651_v27 = vmax.f32 %v1648_v23, 0.0 }
 0x705   :  { %v1664_v28 = vmul.f32 %v1657_v8, %v1650_v26 }
 0x706   :  { %v1665_v29 = vmul.f32 %v1661_v25, %v1651_v27 }
 0x707   :  { %1669 = vst [vmem:[#allocation2] sm:$0xff] %v1664_v28  ;;  %1674 = vrot.lane.b32.xlu1 %v1664_v28, %s2242_s25 }
 0x708   :  { %1667 = vst.msk [vmem:[#allocation5 + $0x8] sm:$0xff] %vm62_vm0, %v1665_v29 }
 0x70b   :  { %1685 = vrot.lane.b32.xlu1 %v1664_v28, %s2243_s15 }
 0x70f   :  { %v1671_v31 = vld [vmem:[#allocation5 + $0x8] sm:$0xff]  ;;  %1696 = vrot.lane.b32.xlu1 %v1664_v28, %s2253_s6 }
 0x710   :  { %1676 = vrot.lane.b32.xlu0 %v1671_v31, %s2242_s25 }
 0x713   :  { %1707 = vrot.lane.b32.xlu1 %v1664_v28, %s2254_s29 }
 0x714   :  { %1687 = vrot.lane.b32.xlu0 %v1671_v31, %s2243_s15 }
 0x717   :  { %1718 = vrot.lane.b32.xlu1 %v1664_v28, %s2255_s3 }
 0x718   :  { %1698 = vrot.lane.b32.xlu0 %v1671_v31, %s2253_s6 }
 0x71b   :  { %1729 = vrot.lane.b32.xlu1 %v1664_v28, %s2244_s16 }
 0x71c   :  { %1709 = vrot.lane.b32.xlu0 %v1671_v31, %s2254_s29 }
 0x71f   :  { %1740 = vrot.lane.b32.xlu1 %v1664_v28, %s2245_s24 }
 0x720   :  { %1720 = vrot.lane.b32.xlu0 %v1671_v31, %s2255_s3 }
 0x723   :  { %1751 = vrot.lane.b32.xlu1 %v1664_v28, %s2246_s28 }
 0x724   :  { %1731 = vrot.lane.b32.xlu0 %v1671_v31, %s2244_s16 }
 0x727   :  { %1771 = vperm.xlu1 %2195, %v1768_v7  }
 0x728   :  { %1742 = vrot.lane.b32.xlu0 %v1671_v31, %s2245_s24 }
 0x72c   :  { %1753 = vrot.lane.b32.xlu0 %v1671_v31, %s2246_s28 }
 0x779   :  { %v1675_v12 = vpop.permute.xlu1 %1674 }
 0x77d   :  { %v1686_v32 = vpop.permute.xlu1 %1685 }
 0x781   :  { %v1697_v14 = vpop.permute.xlu1 %1696 }
 0x782   :  { %v1677_v17 = vpop.permute.xlu0 %1676 }
 0x783   :  { %v1678_v16 = vsel %vm137_vm3, %v1675_v12, %v1677_v17 }
 0x784   :  { %1680 = vst [vmem:[#allocation2 + $0x28] sm:$0xff] %v1678_v16  ;;  %v2164_v33 = vpack.c.bf16 %v1678_v16, %v1664_v28 }
 0x785   :  { %v1708_v35 = vpop.permute.xlu1 %1707 }
 0x786   :  { %v1688_v34 = vpop.permute.xlu0 %1687  ;;  %2165 = vmatpush3.bf16.msra.mxu0 %v2164_v33 }
 0x787   :  { %v1689_v36 = vsel %vm170_vm2, %v1686_v32, %v1688_v34  ;;  %2166 = vmatprep.subr.bf16.mxu0 %v2251_v15 }
 0x788   :  { %1691 = vst [vmem:[#allocation2 + $0x50] sm:$0xff] %v1689_v36 }
 0x789   :  { %v1719_v39 = vpop.permute.xlu1 %1718 }
 0x78a   :  { %v1699_v37 = vpop.permute.xlu0 %1698 }
 0x78b   :  { %v1700_v38 = vsel %vm1483_vm7, %v1697_v14, %v1699_v37 }
 0x78c   :  { %1702 = vst [vmem:[#allocation2 + $0x78] sm:$0xff] %v1700_v38  ;;  %v2167_v40 = vpack.c.bf16 %v1700_v38, %v1689_v36 }
 0x78d   :  { %v1730_v43 = vpop.permute.xlu1 %1729 }
 0x78e   :  { %v1710_v41 = vpop.permute.xlu0 %1709  ;;  %2168 = vmatpush3.bf16.msra.mxu0 %v2167_v40 }
 0x78f   :  { %v1711_v42 = vsel %vm1496_vm8, %v1708_v35, %v1710_v41  ;;  %2169 = vmatprep.subr.bf16.mxu0 %v2251_v15 }
 0x790   :  { %1713 = vst [vmem:[#allocation2 + $0xa0] sm:$0xff] %v1711_v42 }
 0x791   :  { %v1741_v49 = vpop.permute.xlu1 %1740 }
 0x792   :  { %v1721_v24 = vpop.permute.xlu0 %1720 }
 0x793   :  { %v1722_v44 = vsel %vm1509_vm9, %v1719_v39, %v1721_v24 }
 0x794   :  { %1724 = vst [vmem:[#allocation2 + $0xc8] sm:$0xff] %v1722_v44  ;;  %v2170_v45 = vpack.c.bf16 %v1722_v44, %v1711_v42 }
 0x795   :  { %v1752_v53 = vpop.permute.xlu1 %1751 }
 0x796   :  { %v1732_v46 = vpop.permute.xlu0 %1731  ;;  %2171 = vmatpush3.bf16.msra.mxu0 %v2170_v45 }
 0x797   :  { %v1733_v48 = vsel %vm203_vm4, %v1730_v43, %v1732_v46  ;;  %2172 = vmatprep.subr.bf16.mxu0 %v2251_v15 }
 0x798   :  { %1735 = vst [vmem:[#allocation2 + $0xf0] sm:$0xff] %v1733_v48 }
 0x79a   :  { %v1743_v30 = vpop.permute.xlu0 %1742 }
 0x79b   :  { %v1744_v51 = vsel %vm236_vm5, %v1741_v49, %v1743_v30 }
 0x79c   :  { %1746 = vst [vmem:[#allocation2 + $0x118] sm:$0xff] %v1744_v51  ;;  %v2173_v52 = vpack.c.bf16 %v1744_v51, %v1733_v48 }
 0x79e   :  { %v1754_v54 = vpop.permute.xlu0 %1753  ;;  %2174 = vmatpush3.bf16.msra.mxu0 %v2173_v52 }
 0x79f   :  { %v1755_v55 = vsel %vm269_vm6, %v1752_v53, %v1754_v54  ;;  %1994 = vmatprep.subr.mxu0 %v2241_v0 }
 0x7a0   :  { %1757 = vst [vmem:[#allocation2 + $0x140] sm:$0xff] %v1755_v55 }
 0x7a2   :  { %1995 = vmatpush3.msra.mxu0 %v1755_v55 }
 0x7a3   :  { %1997 = vmatmul.mubr.msk.f32.vlgmr.msra.gmra.mrb[8].mxu0 %vm435_vm10, %v1758_v56 }
 0x7a6   :  { %v1772_v15 = vpop.permute.xlu1 %1771 }
 0x876   :  { %v1843_v57 = vpop.f32.mrb[8].mxu0 }
 0x877   :  { %v1844_v59 = vadd.f32 %v1843_v57, %v1772_v15  ;;  %v1998_v60 = vpop.f32.mrb[9].mxu0 }
 0x879   :  { %v1847_v47 = vmax.f32 %v1844_v59, 0.0 }
 0x87b   :  { %1848 = vst [vmem:[%s2908_s13] sm:$0x7] %v1847_v47 }
 0x87c   :  { %1853 = vsyncpa [#allocation7], 1 }

</bundles_post_ra>
